<compile_context>
chip_gen: v7x
topology: tpu7x:2x2x1
jax: 0.10.0
libtpu: 0.0.40
codegen_flags: <defaults>
</compile_context>

<pallas_src>
import functools

import jax
import jax.numpy as jnp
from jax import lax
from jax.experimental import pallas as pl
from jax.experimental.pallas import tpu as pltpu


WORD_DIM = 300

# dtype of the hoisted input-projection MXU operands (bf16 cuts MXU passes and
# halves the words DMA).  Set to jnp.float32 for bit-closer parity with the
# f32 PyTorch module.
# TODO(synk): on v7x the projection operands could drop to fp8 (f32 accum) for
# another 2x on the slab DMA; needs a numerics sign-off like the bf16 path.
INPUT_PROJ_DTYPE = jnp.bfloat16


def _round_up(x, m):
    return (x + m - 1) // m * m


def sentence_encoder_kernel(lmax_ref,               # SMEM (NB,) int32 (scalar prefetch): per-tile max length
                            lengths_ref,            # VMEM (Bt, 1) int32
                            words_ref,              # VMEM (L_pad*Bt, E_pad) bf16, time-major slab
                            wih_f_ref, bih_f_ref,   # VMEM (E_pad, 3H) bf16 / (1, 3H) f32
                            wih_b_ref, bih_b_ref,   # VMEM (E_pad, 3H) bf16 / (1, 3H) f32
                            whh_f_ref, bhh_f_ref,   # VMEM (H, 3H) / (1, 3H) f32
                            whh_b_ref, bhh_b_ref,   # VMEM (H, 3H) / (1, 3H) f32
                            gamma_ref, beta_ref,    # VMEM (1, 2H) f32
                            out_ref,                # VMEM (Bt, 2H) f32
                            gi_f_ref, gi_b_ref,     # VMEM scratch (L_pad*Bt, 3H) f32
                            *, t_chunk):
    Bt = lengths_ref.shape[0]
    H = whh_f_ref.shape[0]
    L_pad = words_ref.shape[0] // Bt
    n_chunks = L_pad // t_chunk

    lmax = lmax_ref[pl.program_id(0)]   # this tile's max true length (>= 1)
    lengths = lengths_ref[...]          # (Bt, 1) int32

    # ---- 1) Hoisted input projection for all timesteps of this tile, both
    #         directions, written straight into the gate scratches (no (.,6H)
    #         temporary).  Computed in time chunks; chunks entirely past this
    #         tile's max length are skipped.
    bih_f = bih_f_ref[...]
    bih_b = bih_b_ref[...]
    for c in range(n_chunks):
        r0 = c * t_chunk * Bt           # static row offset of this time chunk

        @pl.when(c * t_chunk < lmax)
        def _():
            x = words_ref[pl.ds(r0, t_chunk * Bt), :]                    # bf16
            gi_f_ref[pl.ds(r0, t_chunk * Bt), :] = (
                jnp.dot(x, wih_f_ref[...], preferred_element_type=jnp.float32) + bih_f)
            gi_b_ref[pl.ds(r0, t_chunk * Bt), :] = (
                jnp.dot(x, wih_b_ref[...], preferred_element_type=jnp.float32) + bih_b)

    # Loop-invariant operands hoisted out of the serial recurrence
    # (JAX does not CSE broadcast_in_dim inside fori_loop).
    whh_f = whh_f_ref[...]
    whh_b = whh_b_ref[...]
    bhh_f = jnp.broadcast_to(bhh_f_ref[...], (Bt, 3 * H))
    bhh_b = jnp.broadcast_to(bhh_b_ref[...], (Bt, 3 * H))

    def gru_cell(gi_t, h, whh, bhh):
        # torch.nn.GRU gate order (r, z, n); n = tanh(i_n + r * (h@Whh_n + bhh_n)).
        gh = jnp.dot(h, whh, preferred_element_type=jnp.float32) + bhh
        r = jax.nn.sigmoid(gi_t[:, :H] + gh[:, :H])
        z = jax.nn.sigmoid(gi_t[:, H:2 * H] + gh[:, H:2 * H])
        n = jnp.tanh(gi_t[:, 2 * H:] + r * gh[:, 2 * H:])
        return (1.0 - z) * n + z * h

    h0 = jnp.zeros((Bt, H), jnp.float32)

    # ---- 2) Fused fwd/bwd recurrence; trip count = this tile's max length.
    # TODO(synk): on v5e with small Bt, pin Whh in the MXU via
    # pltpu.matmul_push_rhs/acc_lhs/pop to avoid re-pushing weights per step.
    def body(i, carry):
        h_f, h_b = carry
        tf = i
        tb = lmax - 1 - i
        rf = pl.multiple_of(tf * Bt, Bt)
        rb = pl.multiple_of(tb * Bt, Bt)
        gi_f_t = gi_f_ref[pl.ds(rf, Bt), :]            # (Bt, 3H)
        gi_b_t = gi_b_ref[pl.ds(rb, Bt), :]            # (Bt, 3H)
        hf_new = gru_cell(gi_f_t, h_f, whh_f, bhh_f)
        hb_new = gru_cell(gi_b_t, h_b, whh_b, bhh_b)
        h_f = jnp.where(tf < lengths, hf_new, h_f)     # freeze rows past their length
        h_b = jnp.where(tb < lengths, hb_new, h_b)
        return (h_f, h_b)

    h_f, h_b = lax.fori_loop(0, lmax, body, (h0, h0))

    # ---- 3) Concat + LayerNorm over features (eps = 1e-5, torch default).
    h = jnp.concatenate([h_f, h_b], axis=-1)           # (Bt, 2H)
    mean = jnp.mean(h, axis=-1, keepdims=True)
    c0 = h - mean
    var = jnp.mean(c0 * c0, axis=-1, keepdims=True)
    out_ref[...] = (c0 * lax.rsqrt(var + 1e-5)) * gamma_ref[...] + beta_ref[...]


def sentence_encoder(words, lengths, params, embedding_dim, *,
                     batch_tile=None, time_chunk=32):
    """words: (B, L, 300), lengths: (B,) -> (B, embedding_dim) f32."""
    B, L, E = words.shape
    assert E == WORD_DIM and embedding_dim % 2 == 0
    H = embedding_dim // 2
    D = embedding_dim
    E_pad = _round_up(WORD_DIM, 128)      # 384: lane-aligned K dimension

    T_CHUNK = max(1, min(time_chunk, L))
    L_pad = _round_up(L, T_CHUNK)

    # ---- per-generation VMEM budget + batch-tile sizing ----
    try:
        vmem_cap = int(pltpu.get_tpu_info().vmem_capacity_bytes)
    except Exception:
        vmem_cap = 64 * 1024 * 1024       # conservative: v7x per-TC VMEM
    vmem_limit = min(int(vmem_cap * 0.8), 100 * 1024 * 1024)

    def vmem_estimate(bt):
        gates = 2 * L_pad * bt * 3 * H * 4              # f32 gate scratch x2
        slab = 2 * L_pad * bt * E_pad * 2               # double-buffered bf16 words
        wts = 2 * (E_pad * 3 * H * 2 + H * 3 * H * 4 + 2 * 3 * H * 4) + 2 * D * 4
        out = 2 * bt * D * 4
        return gates + slab + wts + out + (2 << 20)     # + slack

    B8 = _round_up(B, 8)
    Bt = min(128, B8) if batch_tile is None else max(8, _round_up(batch_tile, 8))
    # TODO(synk): if VMEM is still tight at the target Bt, switch the words
    # slab BlockSpec to pipeline_mode=pl.Buffered(1) and/or store the gate
    # scratches in bf16 before shrinking Bt further.
    while Bt > 8 and vmem_estimate(Bt) > int(vmem_limit * 0.9):
        Bt = max(8, _round_up(Bt // 2, 8))

    B_pad = _round_up(B, Bt)
    NB = B_pad // Bt

    # torch semantics: lengths[lengths == 0] = 1.  (The sort/unsort in the
    # reference only satisfies pack_padded_sequence; masking keeps order.)
    lengths = jnp.maximum(lengths.astype(jnp.int32), 1)
    lengths_pad = jnp.pad(lengths, (0, B_pad - B), constant_values=1)
    lengths_blk = lengths_pad.reshape(NB, Bt, 1)
    # Per-tile max length (bounds both chunk skipping and the serial loop).
    lmax_tiles = jnp.minimum(jnp.max(lengths_blk[:, :, 0], axis=1), L).astype(jnp.int32)

    # Per-batch-tile, time-major word slab: (NB, L_pad*Bt, E_pad); row = t*Bt + b.
    # Cast to bf16 *before* the pad/transpose so this extra HBM pass is halved.
    # TODO(synk): produce this layout upstream (e.g. fused into the embedding
    # lookup) to avoid this extra HBM pass entirely.
    words_bf = words.astype(INPUT_PROJ_DTYPE)
    words_blk = (
        jnp.pad(words_bf, ((0, B_pad - B), (0, L_pad - L), (0, E_pad - E)))
        .reshape(NB, Bt, L_pad, E_pad)
        .transpose(0, 2, 1, 3)
        .reshape(NB, L_pad * Bt, E_pad)
    )

    def pad_wih(w):   # (300, 3H) -> (E_pad, 3H) bf16, zero-padded rows
        return jnp.pad(w, ((0, E_pad - WORD_DIM), (0, 0))).astype(INPUT_PROJ_DTYPE)

    wih_f = pad_wih(params["wih_f"])
    wih_b = pad_wih(params["wih_b"])

    grid_spec = pltpu.PrefetchScalarGridSpec(
        num_scalar_prefetch=1,                                   # lmax_tiles -> SMEM
        grid=(NB,),
        in_specs=[
            pl.BlockSpec((None, Bt, 1), lambda j, *_: (j, 0, 0)),          # lengths tile
            pl.BlockSpec((None, L_pad * Bt, E_pad), lambda j, *_: (j, 0, 0)),  # words slab
            pl.BlockSpec((E_pad, 3 * H), lambda j, *_: (0, 0)),            # wih_f
            pl.BlockSpec((1, 3 * H), lambda j, *_: (0, 0)),                # bih_f
            pl.BlockSpec((E_pad, 3 * H), lambda j, *_: (0, 0)),            # wih_b
            pl.BlockSpec((1, 3 * H), lambda j, *_: (0, 0)),                # bih_b
            pl.BlockSpec((H, 3 * H), lambda j, *_: (0, 0)),                # whh_f
            pl.BlockSpec((1, 3 * H), lambda j, *_: (0, 0)),                # bhh_f
            pl.BlockSpec((H, 3 * H), lambda j, *_: (0, 0)),                # whh_b
            pl.BlockSpec((1, 3 * H), lambda j, *_: (0, 0)),                # bhh_b
            pl.BlockSpec((1, D), lambda j, *_: (0, 0)),                    # gamma
            pl.BlockSpec((1, D), lambda j, *_: (0, 0)),                    # beta
        ],
        out_specs=pl.BlockSpec((Bt, D), lambda j, *_: (j, 0)),
        scratch_shapes=[
            # TODO(synk): store these in bf16 on v7x to halve the dominant
            # VMEM consumer (needs a numerics sign-off like the bf16 projection).
            pltpu.VMEM((L_pad * Bt, 3 * H), jnp.float32),   # precomputed fwd gates
            pltpu.VMEM((L_pad * Bt, 3 * H), jnp.float32),   # precomputed bwd gates
        ],
    )

    out_pad = pl.pallas_call(
        functools.partial(sentence_encoder_kernel, t_chunk=T_CHUNK),
        out_shape=jax.ShapeDtypeStruct((B_pad, D), jnp.float32),
        grid_spec=grid_spec,
        compiler_params=pltpu.CompilerParams(
            dimension_semantics=("parallel",),        # shard batch tiles across TCs
            vmem_limit_bytes=vmem_limit,
        ),
    )(lmax_tiles, lengths_blk, words_blk,
      wih_f, params["bih_f"], wih_b, params["bih_b"],
      params["whh_f"], params["bhh_f"], params["whh_b"], params["bhh_b"],
      params["gamma"], params["beta"])

    return out_pad[:B]


def init_params(key, embedding_dim):
    """Deterministic synthetic init mirroring torch.nn.GRU's U(-1/sqrt(H), 1/sqrt(H))."""
    H = embedding_dim // 2
    bound = 1.0 / (H ** 0.5)
    keys = jax.random.split(key, 8)

    def u(k, shape):
        return jax.random.uniform(k, shape, jnp.float32, -bound, bound)

    # Weights stored pre-transposed: (in_features, 3H) so the kernel does x @ W.
    return {
        "wih_f": u(keys[0], (WORD_DIM, 3 * H)),
        "whh_f": u(keys[1], (H, 3 * H)),
        "bih_f": u(keys[2], (1, 3 * H)),
        "bhh_f": u(keys[3], (1, 3 * H)),
        "wih_b": u(keys[4], (WORD_DIM, 3 * H)),
        "whh_b": u(keys[5], (H, 3 * H)),
        "bih_b": u(keys[6], (1, 3 * H)),
        "bhh_b": u(keys[7], (1, 3 * H)),
        "gamma": jnp.ones((1, embedding_dim), jnp.float32),   # nn.LayerNorm defaults
        "beta": jnp.zeros((1, embedding_dim), jnp.float32),
    }


def reference_jax(words, lengths, params, embedding_dim, input_proj_dtype=jnp.float32):
    """Pure-JAX reference (masked bidirectional GRU + LayerNorm).

    With input_proj_dtype=float32 this is the exact f32 module semantics; with
    bfloat16 it mirrors the kernel's quantized (bf16-operand, f32-accumulate)
    hoisted input projection so the kernel logic can be checked tightly.
    """
    H = embedding_dim // 2
    B, L, _ = words.shape
    lengths = jnp.maximum(lengths.astype(jnp.int32), 1)
    w = words.astype(jnp.float32)
    ts = jnp.arange(L)

    def proj(wih, bih):
        return jnp.einsum("ble,eg->blg",
                          w.astype(input_proj_dtype), wih.astype(input_proj_dtype),
                          preferred_element_type=jnp.float32) + bih          # (B, L, 3H) f32

    def run_dir(gi, whh, bhh, reverse):
        def step(h, inp):
            g_t, t = inp                                   # g_t: (B, 3H)
            gh = h @ whh + bhh
            r = jax.nn.sigmoid(g_t[:, :H] + gh[:, :H])
            z = jax.nn.sigmoid(g_t[:, H:2 * H] + gh[:, H:2 * H])
            n = jnp.tanh(g_t[:, 2 * H:] + r * gh[:, 2 * H:])
            h_new = (1.0 - z) * n + z * h
            return jnp.where((t < lengths)[:, None], h_new, h), None

        h0 = jnp.zeros((B, H), jnp.float32)
        gi_tm = jnp.transpose(gi, (1, 0, 2))               # (L, B, 3H)
        h, _ = lax.scan(step, h0, (gi_tm, ts), reverse=reverse)
        return h

    h_f = run_dir(proj(params["wih_f"], params["bih_f"]),
                  params["whh_f"], params["bhh_f"], reverse=False)
    h_b = run_dir(proj(params["wih_b"], params["bih_b"]),
                  params["whh_b"], params["bhh_b"], reverse=True)
    h = jnp.concatenate([h_f, h_b], axis=-1)
    mean = h.mean(-1, keepdims=True)
    var = ((h - mean) ** 2).mean(-1, keepdims=True)
    return (h - mean) / jnp.sqrt(var + 1e-5) * params["gamma"] + params["beta"]


if __name__ == "__main__":
    B, L, D = 4, 8, 256          # embedding_dim=256 -> per-direction hidden H=128
    key = jax.random.PRNGKey(0)
    k_words, k_params = jax.random.split(key)

    words = jax.random.normal(k_words, (B, L, WORD_DIM), jnp.float32)
    lengths = jnp.array([8, 3, 5, 0], jnp.int32)   # unsorted + a zero length
    params = init_params(k_params, D)

    out = jax.block_until_ready(sentence_encoder(words, lengths, params, D))
    assert out.shape == (B, D)

    # Tight check vs a reference that mirrors the kernel's bf16 input-projection
    # operands (isolates the documented quantization of the hoisted matmul).
    ref_matched = reference_jax(words, lengths, params, D, input_proj_dtype=INPUT_PROJ_DTYPE)
    assert bool(jnp.allclose(out, ref_matched, rtol=2e-3, atol=2e-3)), \
        "mismatch vs matched-precision JAX reference"

    # Coarse sanity vs the exact f32 reference (bf16 projection only perturbs
    # the LayerNormed output at the ~1e-2 level).
    ref_f32 = reference_jax(words, lengths, params, D, input_proj_dtype=jnp.float32)
    assert float(jnp.max(jnp.abs(out - ref_f32))) < 1e-1, "drift vs f32 reference too large"

    # Second config: multi-tile grid (NB=2), per-tile lmax, and L not a
    # multiple of the time chunk (exercises chunk skipping + time padding).
    B2, L2 = 12, 10
    k_w2, k_l2 = jax.random.split(jax.random.PRNGKey(1))
    words2 = jax.random.normal(k_w2, (B2, L2, WORD_DIM), jnp.float32)
    lengths2 = jax.random.randint(k_l2, (B2,), 0, L2 + 1).astype(jnp.int32)
    out2 = jax.block_until_ready(
        sentence_encoder(words2, lengths2, params, D, batch_tile=8, time_chunk=4))
    ref2 = reference_jax(words2, lengths2, params, D, input_proj_dtype=INPUT_PROJ_DTYPE)
    assert bool(jnp.allclose(out2, ref2, rtol=2e-3, atol=2e-3)), \
        "multi-tile mismatch vs matched-precision JAX reference"

    print("KERNEL_OK")
</pallas_src>

<mosaic_0001>
module attributes {stable_mosaic.version = 11 : i64} {
  func.func @sentence_encoder_kernel(%arg0: i32, %arg1: memref<1xi32, #tpu.memory_space<smem>>, %arg2: memref<1x8x1xi32, #tpu.memory_space<vmem>>, %arg3: memref<1x64x384xbf16, #tpu.memory_space<vmem>>, %arg4: memref<384x384xbf16, #tpu.memory_space<vmem>>, %arg5: memref<1x384xf32, #tpu.memory_space<vmem>>, %arg6: memref<384x384xbf16, #tpu.memory_space<vmem>>, %arg7: memref<1x384xf32, #tpu.memory_space<vmem>>, %arg8: memref<128x384xf32, #tpu.memory_space<vmem>>, %arg9: memref<1x384xf32, #tpu.memory_space<vmem>>, %arg10: memref<128x384xf32, #tpu.memory_space<vmem>>, %arg11: memref<1x384xf32, #tpu.memory_space<vmem>>, %arg12: memref<1x256xf32, #tpu.memory_space<vmem>>, %arg13: memref<1x256xf32, #tpu.memory_space<vmem>>, %arg14: memref<8x256xf32, #tpu.memory_space<vmem>>, %arg15: memref<64x384xf32, #tpu.memory_space<vmem>>, %arg16: memref<64x384xf32, #tpu.memory_space<vmem>>) attributes {dimension_semantics = [#tpu.dimension_semantics<parallel>], iteration_bounds = array<i64: 1>, scalar_prefetch = 1 : i64, scratch_operands = 2 : i64, tpu.core_type = #tpu.core_type<tc>, window_params = [{transform_indices = @transform_0, window_bounds = array<i64: 1, 8, 1>}, {transform_indices = @transform_1, window_bounds = array<i64: 1, 64, 384>}, {pipeline_mode = #tpu.pipeline_mode<synchronous>, transform_indices = @transform_2, window_bounds = array<i64: 384, 384>}, {pipeline_mode = #tpu.pipeline_mode<synchronous>, transform_indices = @transform_3, window_bounds = array<i64: 1, 384>}, {pipeline_mode = #tpu.pipeline_mode<synchronous>, transform_indices = @transform_4, window_bounds = array<i64: 384, 384>}, {pipeline_mode = #tpu.pipeline_mode<synchronous>, transform_indices = @transform_5, window_bounds = array<i64: 1, 384>}, {pipeline_mode = #tpu.pipeline_mode<synchronous>, transform_indices = @transform_6, window_bounds = array<i64: 128, 384>}, {pipeline_mode = #tpu.pipeline_mode<synchronous>, transform_indices = @transform_7, window_bounds = array<i64: 1, 384>}, {pipeline_mode = #tpu.pipeline_mode<synchronous>, transform_indices = @transform_8, window_bounds = array<i64: 128, 384>}, {pipeline_mode = #tpu.pipeline_mode<synchronous>, transform_indices = @transform_9, window_bounds = array<i64: 1, 384>}, {pipeline_mode = #tpu.pipeline_mode<synchronous>, transform_indices = @transform_10, window_bounds = array<i64: 1, 256>}, {pipeline_mode = #tpu.pipeline_mode<synchronous>, transform_indices = @transform_11, window_bounds = array<i64: 1, 256>}, {transform_indices = @transform_12, window_bounds = array<i64: 8, 256>}]} {
    %0 = arith.index_cast %arg0 : i32 to index
    %1 = memref.load %arg1[%0] : memref<1xi32, #tpu.memory_space<smem>>
    %c0 = arith.constant 0 : index
    %c0_0 = arith.constant 0 : index
    %c0_1 = arith.constant 0 : index
    %2 = vector.load %arg2[%c0, %c0_0, %c0_1] : memref<1x8x1xi32, #tpu.memory_space<vmem>>, vector<1x8x1xi32>
    %3 = vector.shape_cast %2 : vector<1x8x1xi32> to vector<8x1xi32>
    %c0_2 = arith.constant 0 : index
    %c0_3 = arith.constant 0 : index
    %4 = vector.load %arg5[%c0_2, %c0_3] : memref<1x384xf32, #tpu.memory_space<vmem>>, vector<1x384xf32>
    %c0_4 = arith.constant 0 : index
    %c0_5 = arith.constant 0 : index
    %5 = vector.load %arg7[%c0_4, %c0_5] : memref<1x384xf32, #tpu.memory_space<vmem>>, vector<1x384xf32>
    %c0_i32 = arith.constant 0 : i32
    %6 = arith.cmpi sgt, %1, %c0_i32 : i32
    %7 = arith.extui %6 : i1 to i32
    %c0_i32_6 = arith.constant 0 : i32
    %8 = arith.cmpi ne, %7, %c0_i32_6 : i32
    scf.if %8 {
      %c0_27 = arith.constant 0 : index
      %c0_28 = arith.constant 0 : index
      %c0_29 = arith.constant 0 : index
      %45 = vector.load %arg3[%c0_27, %c0_28, %c0_29] : memref<1x64x384xbf16, #tpu.memory_space<vmem>>, vector<1x64x384xbf16>
      %46 = vector.shape_cast %45 : vector<1x64x384xbf16> to vector<64x384xbf16>
      %c0_30 = arith.constant 0 : index
      %c0_31 = arith.constant 0 : index
      %47 = vector.load %arg4[%c0_30, %c0_31] : memref<384x384xbf16, #tpu.memory_space<vmem>>, vector<384x384xbf16>
      %cst_32 = arith.constant dense<0.000000e+00> : vector<64x384xf32>
      %48 = tpu.matmul %46, %47, %cst_32 {dimension_numbers = #tpu.dot_dimension_numbers<[1], [0], [0], [1], [0, 0, 1, 1], [], []>} : vector<64x384xbf16>, vector<384x384xbf16>, vector<64x384xf32> -> vector<64x384xf32>
      %49 = vector.broadcast %4 : vector<1x384xf32> to vector<64x384xf32>
      %50 = arith.addf %48, %49 : vector<64x384xf32>
      %c0_33 = arith.constant 0 : index
      %c0_34 = arith.constant 0 : index
      %51 = vector.load %arg15[%c0_33, %c0_34] : memref<64x384xf32, #tpu.memory_space<vmem>>, vector<64x384xf32>
      tpu.vector_store %arg15[%c0_33, %c0_34], %50 {strides = array<i32>} : memref<64x384xf32, #tpu.memory_space<vmem>>, vector<64x384xf32>,
      %c0_35 = arith.constant 0 : index
      %c0_36 = arith.constant 0 : index
      %52 = vector.load %arg6[%c0_35, %c0_36] : memref<384x384xbf16, #tpu.memory_space<vmem>>, vector<384x384xbf16>
      %cst_37 = arith.constant dense<0.000000e+00> : vector<64x384xf32>
      %53 = tpu.matmul %46, %52, %cst_37 {dimension_numbers = #tpu.dot_dimension_numbers<[1], [0], [0], [1], [0, 0, 1, 1], [], []>} : vector<64x384xbf16>, vector<384x384xbf16>, vector<64x384xf32> -> vector<64x384xf32>
      %54 = vector.broadcast %5 : vector<1x384xf32> to vector<64x384xf32>
      %55 = arith.addf %53, %54 : vector<64x384xf32>
      %c0_38 = arith.constant 0 : index
      %c0_39 = arith.constant 0 : index
      %56 = vector.load %arg16[%c0_38, %c0_39] : memref<64x384xf32, #tpu.memory_space<vmem>>, vector<64x384xf32>
      tpu.vector_store %arg16[%c0_38, %c0_39], %55 {strides = array<i32>} : memref<64x384xf32, #tpu.memory_space<vmem>>, vector<64x384xf32>,
    } else {
    }
    %c0_7 = arith.constant 0 : index
    %c0_8 = arith.constant 0 : index
    %9 = vector.load %arg8[%c0_7, %c0_8] : memref<128x384xf32, #tpu.memory_space<vmem>>, vector<128x384xf32>
    %c0_9 = arith.constant 0 : index
    %c0_10 = arith.constant 0 : index
    %10 = vector.load %arg10[%c0_9, %c0_10] : memref<128x384xf32, #tpu.memory_space<vmem>>, vector<128x384xf32>
    %c0_11 = arith.constant 0 : index
    %c0_12 = arith.constant 0 : index
    %11 = vector.load %arg9[%c0_11, %c0_12] : memref<1x384xf32, #tpu.memory_space<vmem>>, vector<1x384xf32>
    %12 = vector.shape_cast %11 : vector<1x384xf32> to vector<1x384xf32>
    %13 = vector.broadcast %12 : vector<1x384xf32> to vector<8x384xf32>
    %c0_13 = arith.constant 0 : index
    %c0_14 = arith.constant 0 : index
    %14 = vector.load %arg11[%c0_13, %c0_14] : memref<1x384xf32, #tpu.memory_space<vmem>>, vector<1x384xf32>
    %15 = vector.shape_cast %14 : vector<1x384xf32> to vector<1x384xf32>
    %16 = vector.broadcast %15 : vector<1x384xf32> to vector<8x384xf32>
    %cst = arith.constant 0.000000e+00 : f32
    %17 = vector.broadcast %cst : f32 to vector<8x128xf32>
    %c0_i32_15 = arith.constant 0 : i32
    %18 = arith.subi %1, %c0_i32_15 : i32
    %19 = arith.addi %c0_i32_15, %18 : i32
    %c1_i32 = arith.constant 1 : i32
    %20:2 = scf.for %arg17 = %c0_i32_15 to %19 step %c1_i32 iter_args(%arg18 = %17, %arg19 = %17) -> (vector<8x128xf32>, vector<8x128xf32>)  : i32 {
      %c1_i32_27 = arith.constant 1 : i32
      %45 = arith.subi %1, %c1_i32_27 : i32
      %46 = arith.subi %45, %arg17 : i32
      %c8_i32 = arith.constant 8 : i32
      %47 = arith.muli %arg17, %c8_i32 : i32
      %48 = tpu.assume_multiple %47, 8 : i32
      %c8_i32_28 = arith.constant 8 : i32
      %49 = arith.muli %46, %c8_i32_28 : i32
      %50 = tpu.assume_multiple %49, 8 : i32
      %51 = arith.index_cast %48 : i32 to index
      %c0_29 = arith.constant 0 : index
      %52 = vector.load %arg15[%51, %c0_29] : memref<64x384xf32, #tpu.memory_space<vmem>>, vector<8x384xf32>
      %53 = arith.index_cast %50 : i32 to index
      %c0_30 = arith.constant 0 : index
      %54 = vector.load %arg16[%53, %c0_30] : memref<64x384xf32, #tpu.memory_space<vmem>>, vector<8x384xf32>
      %cst_31 = arith.constant dense<0.000000e+00> : vector<8x384xf32>
      %55 = tpu.matmul %arg18, %9, %cst_31 {dimension_numbers = #tpu.dot_dimension_numbers<[1], [0], [0], [1], [0, 0, 1, 1], [], []>} : vector<8x128xf32>, vector<128x384xf32>, vector<8x384xf32> -> vector<8x384xf32>
      %56 = arith.addf %55, %13 : vector<8x384xf32>
      %57 = vector.extract_strided_slice %52 {offsets = [0, 0], sizes = [8, 128], strides = [1, 1]} : vector<8x384xf32> to vector<8x128xf32>
      %58 = vector.extract_strided_slice %56 {offsets = [0, 0], sizes = [8, 128], strides = [1, 1]} : vector<8x384xf32> to vector<8x128xf32>
      %59 = arith.addf %57, %58 : vector<8x128xf32>
      %60 = arith.negf %59 : vector<8x128xf32>
      %61 = math.exp %60 : vector<8x128xf32>
      %cst_32 = arith.constant 1.000000e+00 : f32
      %62 = vector.broadcast %cst_32 : f32 to vector<8x128xf32>
      %63 = arith.addf %62, %61 : vector<8x128xf32>
      %64 = arith.divf %62, %63 : vector<8x128xf32>
      %65 = vector.extract_strided_slice %52 {offsets = [0, 128], sizes = [8, 128], strides = [1, 1]} : vector<8x384xf32> to vector<8x128xf32>
      %66 = vector.extract_strided_slice %56 {offsets = [0, 128], sizes = [8, 128], strides = [1, 1]} : vector<8x384xf32> to vector<8x128xf32>
      %67 = arith.addf %65, %66 : vector<8x128xf32>
      %68 = arith.negf %67 : vector<8x128xf32>
      %69 = math.exp %68 : vector<8x128xf32>
      %cst_33 = arith.constant 1.000000e+00 : f32
      %70 = vector.broadcast %cst_33 : f32 to vector<8x128xf32>
      %71 = arith.addf %70, %69 : vector<8x128xf32>
      %72 = arith.divf %70, %71 : vector<8x128xf32>
      %73 = vector.extract_strided_slice %52 {offsets = [0, 256], sizes = [8, 128], strides = [1, 1]} : vector<8x384xf32> to vector<8x128xf32>
      %74 = vector.extract_strided_slice %56 {offsets = [0, 256], sizes = [8, 128], strides = [1, 1]} : vector<8x384xf32> to vector<8x128xf32>
      %75 = arith.mulf %64, %74 : vector<8x128xf32>
      %76 = arith.addf %73, %75 : vector<8x128xf32>
      %77 = math.tanh %76 : vector<8x128xf32>
      %cst_34 = arith.constant 1.000000e+00 : f32
      %78 = vector.broadcast %cst_34 : f32 to vector<8x128xf32>
      %79 = arith.subf %78, %72 : vector<8x128xf32>
      %80 = arith.mulf %79, %77 : vector<8x128xf32>
      %81 = arith.mulf %72, %arg18 : vector<8x128xf32>
      %82 = arith.addf %80, %81 : vector<8x128xf32>
      %cst_35 = arith.constant dense<0.000000e+00> : vector<8x384xf32>
      %83 = tpu.matmul %arg19, %10, %cst_35 {dimension_numbers = #tpu.dot_dimension_numbers<[1], [0], [0], [1], [0, 0, 1, 1], [], []>} : vector<8x128xf32>, vector<128x384xf32>, vector<8x384xf32> -> vector<8x384xf32>
      %84 = arith.addf %83, %16 : vector<8x384xf32>
      %85 = vector.extract_strided_slice %54 {offsets = [0, 0], sizes = [8, 128], strides = [1, 1]} : vector<8x384xf32> to vector<8x128xf32>
      %86 = vector.extract_strided_slice %84 {offsets = [0, 0], sizes = [8, 128], strides = [1, 1]} : vector<8x384xf32> to vector<8x128xf32>
      %87 = arith.addf %85, %86 : vector<8x128xf32>
      %88 = arith.negf %87 : vector<8x128xf32>
      %89 = math.exp %88 : vector<8x128xf32>
      %cst_36 = arith.constant 1.000000e+00 : f32
      %90 = vector.broadcast %cst_36 : f32 to vector<8x128xf32>
      %91 = arith.addf %90, %89 : vector<8x128xf32>
      %92 = arith.divf %90, %91 : vector<8x128xf32>
      %93 = vector.extract_strided_slice %54 {offsets = [0, 128], sizes = [8, 128], strides = [1, 1]} : vector<8x384xf32> to vector<8x128xf32>
      %94 = vector.extract_strided_slice %84 {offsets = [0, 128], sizes = [8, 128], strides = [1, 1]} : vector<8x384xf32> to vector<8x128xf32>
      %95 = arith.addf %93, %94 : vector<8x128xf32>
      %96 = arith.negf %95 : vector<8x128xf32>
      %97 = math.exp %96 : vector<8x128xf32>
      %cst_37 = arith.constant 1.000000e+00 : f32
      %98 = vector.broadcast %cst_37 : f32 to vector<8x128xf32>
      %99 = arith.addf %98, %97 : vector<8x128xf32>
      %100 = arith.divf %98, %99 : vector<8x128xf32>
      %101 = vector.extract_strided_slice %54 {offsets = [0, 256], sizes = [8, 128], strides = [1, 1]} : vector<8x384xf32> to vector<8x128xf32>
      %102 = vector.extract_strided_slice %84 {offsets = [0, 256], sizes = [8, 128], strides = [1, 1]} : vector<8x384xf32> to vector<8x128xf32>
      %103 = arith.mulf %92, %102 : vector<8x128xf32>
      %104 = arith.addf %101, %103 : vector<8x128xf32>
      %105 = math.tanh %104 : vector<8x128xf32>
      %cst_38 = arith.constant 1.000000e+00 : f32
      %106 = vector.broadcast %cst_38 : f32 to vector<8x128xf32>
      %107 = arith.subf %106, %100 : vector<8x128xf32>
      %108 = arith.mulf %107, %105 : vector<8x128xf32>
      %109 = arith.mulf %100, %arg19 : vector<8x128xf32>
      %110 = arith.addf %108, %109 : vector<8x128xf32>
      %111 = vector.broadcast %arg17 : i32 to vector<8x1xi32>
      %112 = arith.cmpi slt, %111, %3 : vector<8x1xi32>
      %113 = vector.shape_cast %112 : vector<8x1xi1> to vector<8x1xi1>
      %114 = vector.broadcast %113 : vector<8x1xi1> to vector<8x128xi1>
      %115 = arith.select %114, %82, %arg18 : vector<8x128xi1>, vector<8x128xf32>
      %116 = vector.broadcast %46 : i32 to vector<8x1xi32>
      %117 = arith.cmpi slt, %116, %3 : vector<8x1xi32>
      %118 = vector.shape_cast %117 : vector<8x1xi1> to vector<8x1xi1>
      %119 = vector.broadcast %118 : vector<8x1xi1> to vector<8x128xi1>
      %120 = arith.select %119, %110, %arg19 : vector<8x128xi1>, vector<8x128xf32>
      scf.yield %115, %120 : vector<8x128xf32>, vector<8x128xf32>
    }
    %21 = tpu.concatenate %20#0, %20#1 in 1 : vector<8x128xf32>, vector<8x128xf32> -> vector<8x256xf32>
    %cst_16 = arith.constant dense<0.000000e+00> : vector<8xf32>
    %22 = vector.multi_reduction <add>, %21, %cst_16 [1] : vector<8x256xf32> to vector<8xf32>
    %23 = vector.shape_cast %22 : vector<8xf32> to vector<8x1xf32>
    %cst_17 = arith.constant 2.560000e+02 : f32
    %24 = vector.broadcast %cst_17 : f32 to vector<8x1xf32>
    %25 = arith.divf %23, %24 : vector<8x1xf32>
    %26 = vector.broadcast %25 : vector<8x1xf32> to vector<8x256xf32>
    %27 = arith.subf %21, %26 : vector<8x256xf32>
    %28 = arith.mulf %27, %27 : vector<8x256xf32>
    %cst_18 = arith.constant dense<0.000000e+00> : vector<8xf32>
    %29 = vector.multi_reduction <add>, %28, %cst_18 [1] : vector<8x256xf32> to vector<8xf32>
    %30 = vector.shape_cast %29 : vector<8xf32> to vector<8x1xf32>
    %cst_19 = arith.constant 2.560000e+02 : f32
    %31 = vector.broadcast %cst_19 : f32 to vector<8x1xf32>
    %32 = arith.divf %30, %31 : vector<8x1xf32>
    %cst_20 = arith.constant 9.99999974E-6 : f32
    %33 = vector.broadcast %cst_20 : f32 to vector<8x1xf32>
    %34 = arith.addf %32, %33 : vector<8x1xf32>
    %35 = math.rsqrt %34 : vector<8x1xf32>
    %36 = vector.broadcast %35 : vector<8x1xf32> to vector<8x256xf32>
    %37 = arith.mulf %27, %36 : vector<8x256xf32>
    %c0_21 = arith.constant 0 : index
    %c0_22 = arith.constant 0 : index
    %38 = vector.load %arg12[%c0_21, %c0_22] : memref<1x256xf32, #tpu.memory_space<vmem>>, vector<1x256xf32>
    %39 = vector.broadcast %38 : vector<1x256xf32> to vector<8x256xf32>
    %40 = arith.mulf %37, %39 : vector<8x256xf32>
    %c0_23 = arith.constant 0 : index
    %c0_24 = arith.constant 0 : index
    %41 = vector.load %arg13[%c0_23, %c0_24] : memref<1x256xf32, #tpu.memory_space<vmem>>, vector<1x256xf32>
    %42 = vector.broadcast %41 : vector<1x256xf32> to vector<8x256xf32>
    %43 = arith.addf %40, %42 : vector<8x256xf32>
    %c0_25 = arith.constant 0 : index
    %c0_26 = arith.constant 0 : index
    %44 = vector.load %arg14[%c0_25, %c0_26] : memref<8x256xf32, #tpu.memory_space<vmem>>, vector<8x256xf32>
    tpu.vector_store %arg14[%c0_25, %c0_26], %43 {strides = array<i32>} : memref<8x256xf32, #tpu.memory_space<vmem>>, vector<8x256xf32>,
    return
  }
  func.func @transform_0(%arg0: i32, %arg1: memref<1xi32, #tpu.memory_space<smem>>) -> (i32, i32, i32) {
    %c0_i32 = arith.constant 0 : i32
    %c0_i32_0 = arith.constant 0 : i32
    %c0_i32_1 = arith.constant 0 : i32
    return %arg0, %c0_i32, %c0_i32_0 : i32, i32, i32
  }
  func.func @transform_1(%arg0: i32, %arg1: memref<1xi32, #tpu.memory_space<smem>>) -> (i32, i32, i32) {
    %c0_i32 = arith.constant 0 : i32
    %c0_i32_0 = arith.constant 0 : i32
    %c0_i32_1 = arith.constant 0 : i32
    return %arg0, %c0_i32, %c0_i32_0 : i32, i32, i32
  }
  func.func @transform_2(%arg0: i32, %arg1: memref<1xi32, #tpu.memory_space<smem>>) -> (i32, i32) {
    %c0_i32 = arith.constant 0 : i32
    %c0_i32_0 = arith.constant 0 : i32
    %c0_i32_1 = arith.constant 0 : i32
    return %c0_i32, %c0_i32_0 : i32, i32
  }
  func.func @transform_3(%arg0: i32, %arg1: memref<1xi32, #tpu.memory_space<smem>>) -> (i32, i32) {
    %c0_i32 = arith.constant 0 : i32
    %c0_i32_0 = arith.constant 0 : i32
    %c0_i32_1 = arith.constant 0 : i32
    return %c0_i32, %c0_i32_0 : i32, i32
  }
  func.func @transform_4(%arg0: i32, %arg1: memref<1xi32, #tpu.memory_space<smem>>) -> (i32, i32) {
    %c0_i32 = arith.constant 0 : i32
    %c0_i32_0 = arith.constant 0 : i32
    %c0_i32_1 = arith.constant 0 : i32
    return %c0_i32, %c0_i32_0 : i32, i32
  }
  func.func @transform_5(%arg0: i32, %arg1: memref<1xi32, #tpu.memory_space<smem>>) -> (i32, i32) {
    %c0_i32 = arith.constant 0 : i32
    %c0_i32_0 = arith.constant 0 : i32
    %c0_i32_1 = arith.constant 0 : i32
    return %c0_i32, %c0_i32_0 : i32, i32
  }
  func.func @transform_6(%arg0: i32, %arg1: memref<1xi32, #tpu.memory_space<smem>>) -> (i32, i32) {
    %c0_i32 = arith.constant 0 : i32
    %c0_i32_0 = arith.constant 0 : i32
    %c0_i32_1 = arith.constant 0 : i32
    return %c0_i32, %c0_i32_0 : i32, i32
  }
  func.func @transform_7(%arg0: i32, %arg1: memref<1xi32, #tpu.memory_space<smem>>) -> (i32, i32) {
    %c0_i32 = arith.constant 0 : i32
    %c0_i32_0 = arith.constant 0 : i32
    %c0_i32_1 = arith.constant 0 : i32
    return %c0_i32, %c0_i32_0 : i32, i32
  }
  func.func @transform_8(%arg0: i32, %arg1: memref<1xi32, #tpu.memory_space<smem>>) -> (i32, i32) {
    %c0_i32 = arith.constant 0 : i32
    %c0_i32_0 = arith.constant 0 : i32
    %c0_i32_1 = arith.constant 0 : i32
    return %c0_i32, %c0_i32_0 : i32, i32
  }
  func.func @transform_9(%arg0: i32, %arg1: memref<1xi32, #tpu.memory_space<smem>>) -> (i32, i32) {
    %c0_i32 = arith.constant 0 : i32
    %c0_i32_0 = arith.constant 0 : i32
    %c0_i32_1 = arith.constant 0 : i32
    return %c0_i32, %c0_i32_0 : i32, i32
  }
  func.func @transform_10(%arg0: i32, %arg1: memref<1xi32, #tpu.memory_space<smem>>) -> (i32, i32) {
    %c0_i32 = arith.constant 0 : i32
    %c0_i32_0 = arith.constant 0 : i32
    %c0_i32_1 = arith.constant 0 : i32
    return %c0_i32, %c0_i32_0 : i32, i32
  }
  func.func @transform_11(%arg0: i32, %arg1: memref<1xi32, #tpu.memory_space<smem>>) -> (i32, i32) {
    %c0_i32 = arith.constant 0 : i32
    %c0_i32_0 = arith.constant 0 : i32
    %c0_i32_1 = arith.constant 0 : i32
    return %c0_i32, %c0_i32_0 : i32, i32
  }
  func.func @transform_12(%arg0: i32, %arg1: memref<1xi32, #tpu.memory_space<smem>>) -> (i32, i32) {
    %c0_i32 = arith.constant 0 : i32
    %c0_i32_0 = arith.constant 0 : i32
    return %arg0, %c0_i32 : i32, i32
  }
}

</mosaic_0001>

<bundles_post_ra>
// kernel: tpu_custom_call.1
= control target key start
LH: loop header
LB: loop body
LE: loop exit
PB: predicated region body
PF: predicated region fallthrough
CT: control target
= control target key end

     0   :  { %19 = vsyncpa [#allocation7], 0  ;;  %s4194_s0 = inlined_call_operand.<no memory space> [shape: s32[1], index: 0, kind: input, shape index: {}]   ;;  %s4195_s1 = inlined_call_operand.vmem [shape: s32[1,8,1], index: 1, kind: input, shape index: {}]   ;;  %s4196_s2 = inlined_call_operand.hbm [shape: bf16[1,64,384], index: 2, kind: input, shape index: {}]   ;;  %s4197_s3 = inlined_call_operand.hbm [shape: bf16[384,384], index: 3, kind: input, shape index: {}]   ;;  %s4198_s4 = inlined_call_operand.vmem [shape: f32[1,384], index: 4, kind: input, shape index: {}]   ;;  %s4199_s5 = inlined_call_operand.hbm [shape: bf16[384,384], index: 5, kind: input, shape index: {}]   ;;  %s4200_s6 = inlined_call_operand.vmem [shape: f32[1,384], index: 6, kind: input, shape index: {}]   ;;  %s4201_s7 = inlined_call_operand.hbm [shape: f32[128,384], index: 7, kind: input, shape index: {}]   ;;  %s4202_s8 = inlined_call_operand.vmem [shape: f32[1,384], index: 8, kind: input, shape index: {}]   ;;  %s4203_s9 = inlined_call_operand.hbm [shape: f32[128,384], index: 9, kind: input, shape index: {}]   ;;  %s4204_s10 = inlined_call_operand.vmem [shape: f32[1,384], index: 10, kind: input, shape index: {}]   ;;  %s4205_s11 = inlined_call_operand.vmem [shape: f32[1,256], index: 11, kind: input, shape index: {}]   ;;  %s4206_s12 = inlined_call_operand.vmem [shape: f32[1,256], index: 12, kind: input, shape index: {}]   ;;  %s4207_s13 = inlined_call_operand.hbm [shape: f32[8,256], index: 13, kind: output, shape index: {}]  }
   0x1   :  { %20 = vsyncpa [#allocation10], 0 }
   0x2   :  { %21 = vsyncpa [#allocation13], 0 }
   0x3   :  { %22 = vsyncpa [#allocation8], 0  ;;  %s3437_s25 = smov [#allocation9]   ;;  %s3438_s27 = smov [#allocation12]  }
   0x4   :  { %s42_s26 = sshll.u32 %s3437_s25, 4  ;;  %s70_s28 = sshll.u32 %s3438_s27, 4  ;;  %s43_s26 = int_to_ptr.vmem [resolvable:$true] %s42_s26  ;;  %s3522_s28 = int_to_ptr.vmem [resolvable:$true] %s70_s28 }
   0x5   :  { %s3257_s14 = scalar_lea.hbm %s4197_s3, 9216 }
   0x6   :  { %p3258_p0 = scmp.ne.s32.totalorder %s4197_s3, %s3257_s14  ;;  %p3261_p1 = scmp.lt.u32.totalorder %s3257_s14, %s4197_s3 }
   0x8   :  { %p3263_p2 = pnand %p3261_p1, %p3258_p0 }
   0xa   :  { %3266 = shalt.err (!%p3263_p2)
}
   0xb   :  { %s3267_s19 = scalar_lea.vmem %s43_s26, 9216  ;;  %p3272_p4 = scmp.lt.s32.totalorder %s43_s26, %s43_s26 }
   0xc   :  { %p3268_p3 = scmp.ne.s32.totalorder %s43_s26, %s3267_s19  ;;  %p3273_p5 = scmp.lt.s32.totalorder %s3267_s19, %s3267_s19 }
   0xe   :  { %p3274_p6 = por %p3273_p5, %p3272_p4 }
  0x10   :  { %p3275_p7 = pnand %p3274_p6, %p3268_p3 }
  0x12   :  { %3278 = shalt.err (!%p3275_p7)
}
  0x13   :  { %s3439_s20 = smov 192   ;;  %s3440_s21 = smov 12  }
  0x14   :  { %48 = dma.hbm_to_vmem [thread:$0]  %s4197_s3, 9216, %s43_s26, [#allocation10], %s3439_s20, %s3439_s20, %s3440_s21  }
  0x15   :  { %s3279_s27 = scalar_lea.hbm %s4201_s7, 6144 }
  0x16   :  { %p3280_p8 = scmp.ne.s32.totalorder %s4201_s7, %s3279_s27  ;;  %p3283_p9 = scmp.lt.u32.totalorder %s3279_s27, %s4201_s7 }
  0x18   :  { %p3285_p10 = pnand %p3283_p9, %p3280_p8 }
  0x1a   :  { %3288 = shalt.err (!%p3285_p10)
}
  0x1b   :  { %s3289_s16 = scalar_lea.vmem %s3522_s28, 6144  ;;  %p3294_p12 = scmp.lt.s32.totalorder %s3522_s28, %s3522_s28 }
  0x1c   :  { %p3290_p11 = scmp.ne.s32.totalorder %s3522_s28, %s3289_s16  ;;  %p3295_p13 = scmp.lt.s32.totalorder %s3289_s16, %s3289_s16 }
  0x1e   :  { %p3296_p0 = por %p3295_p13, %p3294_p12 }
  0x20   :  { %p3297_p1 = pnand %p3296_p0, %p3290_p11 }
  0x22   :  { %3300 = shalt.err (!%p3297_p1)
}
  0x23   :  { %s3441_s3 = smov 384   ;;  %s3442_s26 = smov 24  }
  0x24   :  { %76 = dma.hbm_to_vmem [thread:$0]  %s4201_s7, 6144, %s3522_s28, [#allocation13], %s3441_s3, %s3441_s3, %s3442_s26  }
  0x25   :  { %s3443_s19 = smov [#allocation6]   ;;  %s3444_s23 = smov [#allocation11]  }
  0x26   :  { %s30_s22 = sshll.u32 %s3443_s19, 4  ;;  %s56_s24 = sshll.u32 %s3444_s23, 4  ;;  %s31_s22 = int_to_ptr.vmem [resolvable:$true] %s30_s22  ;;  %s3559_s24 = int_to_ptr.vmem [resolvable:$true] %s56_s24 }
  0x27   :  { %s3301_s29 = scalar_lea.hbm %s4196_s2, 1536 }
  0x28   :  { %p3302_p2 = scmp.ne.s32.totalorder %s4196_s2, %s3301_s29  ;;  %p3305_p3 = scmp.lt.u32.totalorder %s3301_s29, %s4196_s2 }
  0x2a   :  { %p3307_p4 = pnand %p3305_p3, %p3302_p2 }
  0x2c   :  { %3310 = shalt.err (!%p3307_p4)
}
  0x2d   :  { %s3311_s7 = scalar_lea.vmem %s31_s22, 1536  ;;  %p3316_p6 = scmp.lt.s32.totalorder %s31_s22, %s31_s22 }
  0x2e   :  { %p3312_p5 = scmp.ne.s32.totalorder %s31_s22, %s3311_s7  ;;  %p3317_p7 = scmp.lt.s32.totalorder %s3311_s7, %s3311_s7 }
  0x30   :  { %p3318_p8 = por %p3317_p7, %p3316_p6 }
  0x32   :  { %p3319_p9 = pnand %p3318_p8, %p3312_p5 }
  0x34   :  { %3322 = shalt.err (!%p3319_p9)
}
  0x35   :  { %36 = dma.hbm_to_vmem [thread:$0]  %s4196_s2, 1536, %s31_s22, [#allocation7], %s3439_s20, %s3439_s20, %s3440_s21  }
  0x36   :  { %s3323_s23 = scalar_lea.hbm %s4199_s5, 9216 }
  0x37   :  { %p3324_p10 = scmp.ne.s32.totalorder %s4199_s5, %s3323_s23  ;;  %p3327_p11 = scmp.lt.u32.totalorder %s3323_s23, %s4199_s5 }
  0x39   :  { %p3329_p12 = pnand %p3327_p11, %p3324_p10 }
  0x3b   :  { %3332 = shalt.err (!%p3329_p12)
}
  0x3c   :  { %s3333_s14 = scalar_lea.vmem %s3559_s24, 9216  ;;  %p3338_p0 = scmp.lt.s32.totalorder %s3559_s24, %s3559_s24 }
  0x3d   :  { %p3334_p13 = scmp.ne.s32.totalorder %s3559_s24, %s3333_s14  ;;  %p3339_p1 = scmp.lt.s32.totalorder %s3333_s14, %s3333_s14 }
  0x3f   :  { %p3340_p2 = por %p3339_p1, %p3338_p0 }
  0x41   :  { %p3341_p3 = pnand %p3340_p2, %p3334_p13 }
  0x43   :  { %3344 = shalt.err (!%p3341_p3)
}
  0x44   :  { %62 = dma.hbm_to_vmem [thread:$0]  %s4199_s5, 9216, %s3559_s24, [#allocation10], %s3439_s20, %s3439_s20, %s3440_s21  }
  0x45   :  { %s3445_s15 = smov [#allocation14]   ;;  %s3345_s17 = scalar_lea.hbm %s4203_s9, 6144 }
  0x46   :  { %s84_s16 = sshll.u32 %s3445_s15, 4  ;;  %p3346_p4 = scmp.ne.s32.totalorder %s4203_s9, %s3345_s17  ;;  %s85_s16 = int_to_ptr.vmem [resolvable:$true] %s84_s16 }
  0x47   :  { %p3349_p5 = scmp.lt.u32.totalorder %s3345_s17, %s4203_s9 }
  0x49   :  { %p3351_p6 = pnand %p3349_p5, %p3346_p4 }
  0x4b   :  { %3354 = shalt.err (!%p3351_p6)
}
  0x4c   :  { %s3355_s27 = scalar_lea.vmem %s85_s16, 6144  ;;  %p3360_p8 = scmp.lt.s32.totalorder %s85_s16, %s85_s16 }
  0x4d   :  { %p3356_p7 = scmp.ne.s32.totalorder %s85_s16, %s3355_s27  ;;  %p3361_p9 = scmp.lt.s32.totalorder %s3355_s27, %s3355_s27 }
  0x4f   :  { %p3362_p10 = por %p3361_p9, %p3360_p8 }
  0x51   :  { %p3363_p11 = pnand %p3362_p10, %p3356_p7 }
  0x53   :  { %3366 = shalt.err (!%p3363_p11)
}
  0x54   :  { %90 = dma.hbm_to_vmem [thread:$0]  %s4203_s9, 6144, %s85_s16, [#allocation13], %s3441_s3, %s3441_s3, %s3442_s26  }
  0x55   :  { %3409 = dma.done.wait [#allocation7], 1536  }
  0x56   :  { %3410 = vsyncadd [#allocation7], 4294965760 }
  0x57   :  { %3411 = dma.done.wait [#allocation10], 18432  }
  0x58   :  { %3412 = vsyncadd [#allocation10], 4294948864 }
  0x59   :  { %3413 = dma.done.wait [#allocation13], 12288  }
  0x5a   :  { %3414 = vsyncadd [#allocation13], 4294955008  ;;  %v3614_v0 = vld [vmem:[%s4195_s1] sm:$0xff]  ;;  %p2370_p12 = scmp.le.s32.totalorder %s4194_s0, 0 }
  0x5b   :  { %4211 = vst [vmem:[#allocation20_spill] sm:$0xff] %v3614_v0  ;;  %v3619_v1 = vld [vmem:[%s4198_s4] sm:$0x7]  ;;  %v3026_v3 = vld [vmem:[#allocation9 + $0x4] ss:$12 sps:$4 sm:$0xff] (!%p2370_p12)  }
  0x5c   :  { %v3624_v2 = vld [vmem:[%s4200_s6] sm:$0x7]  ;;  %120 = sbr.rel (%p2370_p12) target bundleno = 496 (0x1f0), region = 73  ;;  %v3028_v4 = vld [vmem:[#allocation9 + $0xc8] ss:$12 sps:$4 sm:$0xff] (!%p2370_p12)   ;;  %697 = vmatprep.subr.bf16.mxu0 (!%p2370_p12), %v3026_v3 }
  0x5d   :  { %v3029_v5 = vld [vmem:[#allocation9] ss:$12 sps:$4 sm:$0xff] (!%p2370_p12)   ;;  %2539 = vmatprep.subr.bf16.mxu1 (!%p2370_p12), %v3028_v4  ;;  %v3030_v6 = vld [vmem:[#allocation9 + $0x8] ss:$12 sps:$4 sm:$0xff] (!%p2370_p12)   ;;  %v3034_v9 = vld [vmem:[#allocation9 + $0x18] ss:$12 sps:$4 sm:$0xff] (!%p2370_p12)  }
  0x5e   :  { %698 = vmatpush1.bf16.msra.mxu0 (!%p2370_p12), %v3029_v5  ;;  %v3031_v7 = vld [vmem:[#allocation9 + $0x1c] ss:$12 sps:$4 sm:$0xff] (!%p2370_p12)   ;;  %2540 = vmatpush3.bf16.msra.mxu1 (!%p2370_p12), %v3030_v6  ;;  %v3033_v8 = vld [vmem:[#allocation9 + $0xe0] ss:$12 sps:$4 sm:$0xff] (!%p2370_p12)   ;;  %v3038_v12 = vld [vmem:[#allocation9 + $0xf8] ss:$12 sps:$4 sm:$0xff] (!%p2370_p12)  }
  0x5f   :  { %699 = vmatprep.subr.bf16.mxu0 (!%p2370_p12), %v3031_v7  ;;  %v3035_v10 = vld [vmem:[#allocation9 + $0x20] ss:$12 sps:$4 sm:$0xff] (!%p2370_p12)   ;;  %2541 = vmatprep.subr.bf16.mxu1 (!%p2370_p12), %v3033_v8  ;;  %v3039_v13 = vld [vmem:[#allocation9 + $0x30] ss:$12 sps:$4 sm:$0xff] (!%p2370_p12)   ;;  %v3040_v14 = vld [vmem:[#allocation9 + $0x38] ss:$12 sps:$4 sm:$0xff] (!%p2370_p12)  }
  0x60   :  { %v3036_v11 = vld [vmem:[#allocation9 + $0x34] ss:$12 sps:$4 sm:$0xff] (!%p2370_p12)   ;;  %v3041_v15 = vld [vmem:[#allocation9 + $0x4c] ss:$12 sps:$4 sm:$0xff] (!%p2370_p12)   ;;  %v3043_v16 = vld [vmem:[#allocation9 + $0x110] ss:$12 sps:$4 sm:$0xff] (!%p2370_p12)  }
  0x61   :  { %v3044_v17 = vld [vmem:[#allocation9 + $0x48] ss:$12 sps:$4 sm:$0xff] (!%p2370_p12)   ;;  %v3045_v18 = vld [vmem:[#allocation9 + $0x50] ss:$12 sps:$4 sm:$0xff] (!%p2370_p12)   ;;  %v3049_v21 = vld [vmem:[#allocation9 + $0x60] ss:$12 sps:$4 sm:$0xff] (!%p2370_p12)  }
  0x62   :  { %700 = vmatpush1.bf16.msra.mxu0 (!%p2370_p12), %v3034_v9  ;;  %2542 = vmatpush3.bf16.msra.mxu1 (!%p2370_p12), %v3035_v10  ;;  %v3046_v19 = vld [vmem:[#allocation9 + $0x64] ss:$12 sps:$4 sm:$0xff] (!%p2370_p12)   ;;  %v3048_v20 = vld [vmem:[#allocation9 + $0x128] ss:$12 sps:$4 sm:$0xff] (!%p2370_p12)   ;;  %v3053_v24 = vld [vmem:[#allocation9 + $0x140] ss:$12 sps:$4 sm:$0xff] (!%p2370_p12)  }
  0x63   :  { %701 = vmatprep.subr.bf16.mxu0 %v3036_v11  ;;  %2543 = vmatprep.subr.bf16.mxu1 %v3038_v12  ;;  %v3050_v22 = vld [vmem:[#allocation9 + $0x68] ss:$12 sps:$4 sm:$0xff]   ;;  %v3054_v25 = vld [vmem:[#allocation9 + $0x78] ss:$12 sps:$4 sm:$0xff]   ;;  %v3055_v26 = vld [vmem:[#allocation9 + $0x80] ss:$12 sps:$4 sm:$0xff]  }
  0x64   :  { %v3051_v23 = vld [vmem:[#allocation9 + $0x7c] ss:$12 sps:$4 sm:$0xff]   ;;  %v3056_v27 = vld [vmem:[#allocation9 + $0x94] ss:$12 sps:$4 sm:$0xff]   ;;  %v3058_v28 = vld [vmem:[#allocation9 + $0x158] ss:$12 sps:$4 sm:$0xff]  }
  0x65   :  { %v3059_v29 = vld [vmem:[#allocation9 + $0x90] ss:$12 sps:$4 sm:$0xff]   ;;  %v3060_v30 = vld [vmem:[#allocation9 + $0x98] ss:$12 sps:$4 sm:$0xff]   ;;  %v3064_v34 = vld [vmem:[#allocation9 + $0xa8] ss:$12 sps:$4 sm:$0xff]  }
  0x66   :  { %702 = vmatpush1.bf16.msra.mxu0 %v3039_v13  ;;  %2544 = vmatpush3.bf16.msra.mxu1 %v3040_v14  ;;  %v3061_v31 = vld [vmem:[#allocation9 + $0xac] ss:$12 sps:$4 sm:$0xff]   ;;  %v3063_v32 = vld [vmem:[#allocation9 + $0x170] ss:$12 sps:$4 sm:$0xff]   ;;  %v3071_v37 = vld [vmem:[#allocation9 + $0x188] ss:$12 sps:$4 sm:$0xff]  }
  0x67   :  { %703 = vmatprep.subr.bf16.mxu0 %v3041_v15  ;;  %2545 = vmatprep.subr.bf16.mxu1 %v3043_v16  ;;  %v3633_v33 = vld [vmem:[#allocation6 + $0x4] ss:$12 sps:$4 sm:$0xff]   ;;  %v3637_v38 = vld [vmem:[#allocation6] ss:$12 sps:$4 sm:$0xff]   ;;  %v3073_v40 = vld [vmem:[#allocation9 + $0xdc] ss:$12 sps:$4 sm:$0xff]  }
  0x68   :  { %v3065_v35 = vld [vmem:[#allocation9 + $0xb0] ss:$12 sps:$4 sm:$0xff]   ;;  %875 = vmatprep.mubr.bf16.mxu1 %v3633_v33  ;;  %729 = vmatprep.mubr.bf16.mxu0 %v3633_v33  ;;  %v3072_v39 = vld [vmem:[#allocation9 + $0xc0] ss:$12 sps:$4 sm:$0xff]   ;;  %v3076_v43 = vld [vmem:[#allocation9 + $0xd8] ss:$12 sps:$4 sm:$0xff]  }
  0x69   :  { %v3068_v36 = vld [vmem:[#allocation9 + $0xc4] ss:$12 sps:$4 sm:$0xff]   ;;  %v3075_v41 = vld [vmem:[#allocation9 + $0x1a0] ss:$12 sps:$4 sm:$0xff]   ;;  %v3639_v42 = vld [vmem:[#allocation6 + $0x1c] ss:$12 sps:$4 sm:$0xff]  }
  0x6a   :  { %704 = vmatpush1.bf16.msra.mxu0 %v3044_v17  ;;  %2546 = vmatpush3.bf16.msra.mxu1 %v3045_v18  ;;  %v3079_v44 = vld [vmem:[#allocation9 + $0xf4] ss:$12 sps:$4 sm:$0xff]   ;;  %v3082_v45 = vld [vmem:[#allocation9 + $0x1b8] ss:$12 sps:$4 sm:$0xff]   ;;  %v3083_v47 = vld [vmem:[#allocation9 + $0xf0] ss:$12 sps:$4 sm:$0xff]  }
  0x6b   :  { %705 = vmatprep.subr.bf16.mxu0 %v3046_v19  ;;  %2547 = vmatprep.subr.bf16.mxu1 %v3048_v20  ;;  %v3643_v46 = vld [vmem:[#allocation6 + $0x18] ss:$12 sps:$4 sm:$0xff]   ;;  %v3086_v49 = vld [vmem:[#allocation9 + $0x1d0] ss:$12 sps:$4 sm:$0xff]   ;;  %v3645_v50 = vld [vmem:[#allocation6 + $0x34] ss:$12 sps:$4 sm:$0xff]  }
  0x6c   :  { %v3084_v48 = vld [vmem:[#allocation9 + $0x10c] ss:$12 sps:$4 sm:$0xff]   ;;  %v3087_v51 = vld [vmem:[#allocation9 + $0x108] ss:$12 sps:$4 sm:$0xff]   ;;  %v3090_v52 = vld [vmem:[#allocation9 + $0x124] ss:$12 sps:$4 sm:$0xff]  }
  0x6d   :  { %v3093_v53 = vld [vmem:[#allocation9 + $0x1e8] ss:$12 sps:$4 sm:$0xff]   ;;  %v3649_v54 = vld [vmem:[#allocation6 + $0x30] ss:$12 sps:$4 sm:$0xff]   ;;  %v3094_v55 = vld [vmem:[#allocation9 + $0x120] ss:$12 sps:$4 sm:$0xff]  }
  0x6e   :  { %706 = vmatpush1.bf16.msra.mxu0 %v3049_v21  ;;  %2548 = vmatpush3.bf16.msra.mxu1 %v3050_v22  ;;  %v3095_v56 = vld [vmem:[#allocation9 + $0x13c] ss:$12 sps:$4 sm:$0xff]   ;;  %v3097_v57 = vld [vmem:[#allocation9 + $0x200] ss:$12 sps:$4 sm:$0xff]   ;;  %v3098_v59 = vld [vmem:[#allocation9 + $0x138] ss:$12 sps:$4 sm:$0xff]  }
  0x6f   :  { %707 = vmatprep.subr.bf16.mxu0 %v3051_v23  ;;  %2549 = vmatprep.subr.bf16.mxu1 %v3053_v24  ;;  %v3651_v58 = vld [vmem:[#allocation6 + $0x4c] ss:$12 sps:$4 sm:$0xff]   ;;  %v3101_v60 = vld [vmem:[#allocation9 + $0x154] ss:$12 sps:$4 sm:$0xff]   ;;  %v3105_v63 = vld [vmem:[#allocation9 + $0x150] ss:$12 sps:$4 sm:$0xff]  }
  0x70   :  { %v3104_v61 = vld [vmem:[#allocation9 + $0x218] ss:$12 sps:$4 sm:$0xff]   ;;  %v3655_v62 = vld [vmem:[#allocation6 + $0x48] ss:$12 sps:$4 sm:$0xff]   ;;  %v3108_v4 = vld [vmem:[#allocation9 + $0x230] ss:$12 sps:$4 sm:$0xff]  }
  0x71   :  { %v3106_v3 = vld [vmem:[#allocation9 + $0x16c] ss:$12 sps:$4 sm:$0xff]   ;;  %v3657_v5 = vld [vmem:[#allocation6 + $0x8] ss:$12 sps:$4 sm:$0xff]   ;;  %v3113_v7 = vld [vmem:[#allocation9 + $0x184] ss:$12 sps:$4 sm:$0xff]  }
  0x72   :  { %708 = vmatpush1.bf16.msra.mxu0 %v3054_v25  ;;  %2550 = vmatpush3.bf16.msra.mxu1 %v3055_v26  ;;  %v3109_v6 = vld [vmem:[#allocation9 + $0x168] ss:$12 sps:$4 sm:$0xff]   ;;  %v3117_v8 = vld [vmem:[#allocation11 + $0x4] ss:$12 sps:$4 sm:$0xff]   ;;  %v3111_v9 = vld [vmem:[#allocation9 + $0x180] ss:$12 sps:$4 sm:$0xff]  }
  0x73   :  { %709 = vmatprep.subr.bf16.mxu0 %v3056_v27  ;;  %2551 = vmatprep.subr.bf16.mxu1 %v3058_v28  ;;  %v3661_v10 = vld [vmem:[#allocation6 + $0x20] ss:$12 sps:$4 sm:$0xff]   ;;  %v3120_v12 = vld [vmem:[#allocation9 + $0x19c] ss:$12 sps:$4 sm:$0xff]   ;;  %v3118_v14 = vld [vmem:[#allocation9 + $0x198] ss:$12 sps:$4 sm:$0xff]  }
  0x74   :  { %v3115_v11 = vld [vmem:[#allocation11] ss:$12 sps:$4 sm:$0xff]   ;;  %v3123_v13 = vld [vmem:[#allocation11 + $0x1c] ss:$12 sps:$4 sm:$0xff]   ;;  %v3664_v15 = vld [vmem:[#allocation6 + $0x38] ss:$12 sps:$4 sm:$0xff]  }
  0x75   :  { %v3121_v16 = vld [vmem:[#allocation11 + $0x18] ss:$12 sps:$4 sm:$0xff]   ;;  %v3127_v17 = vld [vmem:[#allocation9 + $0x1b4] ss:$12 sps:$4 sm:$0xff]   ;;  %v3125_v19 = vld [vmem:[#allocation9 + $0x1b0] ss:$12 sps:$4 sm:$0xff]  }
  0x76   :  { %710 = vmatpush1.bf16.msra.mxu0 %v3059_v29  ;;  %2552 = vmatpush3.bf16.msra.mxu1 %v3060_v30  ;;  %v3131_v18 = vld [vmem:[#allocation11 + $0x34] ss:$12 sps:$4 sm:$0xff]   ;;  %v3669_v20 = vld [vmem:[#allocation6 + $0x50] ss:$12 sps:$4 sm:$0xff]   ;;  %v3134_v22 = vld [vmem:[#allocation9 + $0x1cc] ss:$12 sps:$4 sm:$0xff]  }
  0x77   :  { %711 = vmatprep.subr.bf16.mxu0 %v3061_v31  ;;  %2553 = vmatprep.subr.bf16.mxu1 %v3063_v32  ;;  %v3129_v21 = vld [vmem:[#allocation11 + $0x30] ss:$12 sps:$4 sm:$0xff]   ;;  %v3137_v23 = vld [vmem:[#allocation11 + $0x4c] ss:$12 sps:$4 sm:$0xff]   ;;  %v3132_v24 = vld [vmem:[#allocation9 + $0x1c8] ss:$12 sps:$4 sm:$0xff]  }
  0x78   :  { %v3135_v25 = vld [vmem:[#allocation11 + $0x48] ss:$12 sps:$4 sm:$0xff]   ;;  %v3140_v26 = vld [vmem:[#allocation9 + $0x1e4] ss:$12 sps:$4 sm:$0xff]   ;;  %v3138_v28 = vld [vmem:[#allocation9 + $0x1e0] ss:$12 sps:$4 sm:$0xff]  }
  0x79   :  { %v3143_v27 = vld [vmem:[#allocation11 + $0x64] ss:$12 sps:$4 sm:$0xff]   ;;  %v3141_v29 = vld [vmem:[#allocation11 + $0x60] ss:$12 sps:$4 sm:$0xff]   ;;  %v3146_v30 = vld [vmem:[#allocation9 + $0x1fc] ss:$12 sps:$4 sm:$0xff]  }
  0x7a   :  { %712 = vmatpush1.bf16.msra.mxu0 %v3064_v34  ;;  %2554 = vmatpush3.bf16.msra.mxu1 %v3065_v35  ;;  %v3149_v31 = vld [vmem:[#allocation11 + $0x7c] ss:$12 sps:$4 sm:$0xff]   ;;  %v3144_v32 = vld [vmem:[#allocation9 + $0x1f8] ss:$12 sps:$4 sm:$0xff]   ;;  %v3152_v35 = vld [vmem:[#allocation9 + $0x214] ss:$12 sps:$4 sm:$0xff]  }
  0x7b   :  { %713 = vmatprep.subr.bf16.mxu0 %v3068_v36  ;;  %2677 = vmatprep.subr.bf16.mxu1 %v3071_v37  ;;  %v3147_v34 = vld [vmem:[#allocation11 + $0x78] ss:$12 sps:$4 sm:$0xff]   ;;  %v3155_v36 = vld [vmem:[#allocation11 + $0x94] ss:$12 sps:$4 sm:$0xff]  }
  0x7d   :  { %876 = vmatmul.mubr.bf16.vlgmr.msra.gmra.mrb[0].mxu1 %v3637_v38 }
  0x7e   :  { %714 = vmatpush1.bf16.msra.mxu0 %v3072_v39  ;;  %2678 = vmatpush3.bf16.msra.mxu1 %v3071_v37  ;;  %v3150_v37 = vld [vmem:[#allocation9 + $0x210] ss:$12 sps:$4 sm:$0xff]  }
  0x7f   :  { %715 = vmatprep.subr.bf16.mxu0 %v3073_v40  ;;  %2679 = vmatprep.subr.bf16.mxu1 %v3075_v41  ;;  %v3153_v39 = vld [vmem:[#allocation11 + $0x90] ss:$12 sps:$4 sm:$0xff]   ;;  %v3158_v40 = vld [vmem:[#allocation9 + $0x22c] ss:$12 sps:$4 sm:$0xff]  }
  0x80   :  { %883 = vmatprep.mubr.bf16.mxu1 %v3639_v42 }
  0x82   :  { %716 = vmatpush1.bf16.msra.mxu0 %v3076_v43  ;;  %2680 = vmatpush3.bf16.msra.mxu1 %v3075_v41  ;;  %v3161_v41 = vld [vmem:[#allocation11 + $0xac] ss:$12 sps:$4 sm:$0xff]   ;;  %v3156_v43 = vld [vmem:[#allocation9 + $0x228] ss:$12 sps:$4 sm:$0xff]  }
  0x83   :  { %717 = vmatprep.subr.bf16.mxu0 %v3079_v44  ;;  %2681 = vmatprep.subr.bf16.mxu1 %v3082_v45  ;;  %v3446_v44 = vmov 0  }
  0x85   :  { %884 = vmatmul.mubr.bf16.gmra.mrb[4].mxu1 %v3643_v46 }
  0x86   :  { %718 = vmatpush1.bf16.msra.mxu0 %v3083_v47  ;;  %2682 = vmatpush3.bf16.msra.mxu1 %v3082_v45  ;;  %v3159_v45 = vld [vmem:[#allocation11 + $0xa8] ss:$12 sps:$4 sm:$0xff]  }
  0x87   :  { %719 = vmatprep.subr.bf16.mxu0 %v3084_v48  ;;  %2683 = vmatprep.subr.bf16.mxu1 %v3086_v49  ;;  %v3165_v47 = vld [vmem:[#allocation11 + $0xc8] ss:$12 sps:$4 sm:$0xff]   ;;  %v3164_v48 = vld [vmem:[#allocation11 + $0xc4] ss:$12 sps:$4 sm:$0xff]  }
  0x88   :  { %891 = vmatprep.mubr.bf16.mxu1 %v3645_v50 }
  0x8a   :  { %720 = vmatpush1.bf16.msra.mxu0 %v3087_v51  ;;  %2684 = vmatpush3.bf16.msra.mxu1 %v3086_v49  ;;  %v3162_v49 = vld [vmem:[#allocation11 + $0xc0] ss:$12 sps:$4 sm:$0xff]   ;;  %v3166_v51 = vld [vmem:[#allocation11 + $0x8] ss:$12 sps:$4 sm:$0xff]  }
  0x8b   :  { %721 = vmatprep.subr.bf16.mxu0 %v3090_v52  ;;  %2685 = vmatprep.subr.bf16.mxu1 %v3093_v53  ;;  %v3170_v52 = vld [vmem:[#allocation11 + $0xe0] ss:$12 sps:$4 sm:$0xff]  }
  0x8d   :  { %892 = vmatmul.mubr.bf16.gmra.mrb[8].mxu1 %v3649_v54 }
  0x8e   :  { %722 = vmatpush1.bf16.msra.mxu0 %v3094_v55  ;;  %2686 = vmatpush3.bf16.msra.mxu1 %v3093_v53  ;;  %v3169_v53 = vld [vmem:[#allocation11 + $0xdc] ss:$12 sps:$4 sm:$0xff]   ;;  %v3167_v55 = vld [vmem:[#allocation11 + $0xd8] ss:$12 sps:$4 sm:$0xff]  }
  0x8f   :  { %723 = vmatprep.subr.bf16.mxu0 %v3095_v56  ;;  %2687 = vmatprep.subr.bf16.mxu1 %v3097_v57  ;;  %v3171_v56 = vld [vmem:[#allocation11 + $0x20] ss:$12 sps:$4 sm:$0xff]  }
  0x90   :  { %899 = vmatprep.mubr.bf16.mxu1 %v3651_v58 }
  0x92   :  { %724 = vmatpush1.bf16.msra.mxu0 %v3098_v59  ;;  %2688 = vmatpush3.bf16.msra.mxu1 %v3097_v57  ;;  %v3175_v57 = vld [vmem:[#allocation11 + $0xf8] ss:$12 sps:$4 sm:$0xff]   ;;  %v3174_v59 = vld [vmem:[#allocation11 + $0xf4] ss:$12 sps:$4 sm:$0xff]  }
  0x93   :  { %725 = vmatprep.subr.bf16.mxu0 %v3101_v60  ;;  %2689 = vmatprep.subr.bf16.mxu1 %v3104_v61  ;;  %v3172_v60 = vld [vmem:[#allocation11 + $0xf0] ss:$12 sps:$4 sm:$0xff]  }
  0x95   :  { %900 = vmatmul.mubr.bf16.gmra.mrb[12].mxu1 %v3655_v62 }
  0x96   :  { %726 = vmatpush1.bf16.msra.mxu0 %v3105_v63  ;;  %2690 = vmatpush3.bf16.msra.mxu1 %v3104_v61  ;;  %v3176_v61 = vld [vmem:[#allocation11 + $0x38] ss:$12 sps:$4 sm:$0xff]   ;;  %v3180_v63 = vld [vmem:[#allocation11 + $0x110] ss:$12 sps:$4 sm:$0xff]  }
  0x97   :  { %727 = vmatprep.subr.bf16.mxu0 %v3106_v3  ;;  %2691 = vmatprep.subr.bf16.mxu1 %v3108_v4  ;;  %v3179_v3 = vld [vmem:[#allocation11 + $0x10c] ss:$12 sps:$4 sm:$0xff]  }
  0x98   :  { %2693 = vmatprep.mubr.bf16.mxu1 %v3657_v5 }
  0x9a   :  { %728 = vmatpush1.bf16.msra.mxu0 %v3109_v6  ;;  %2692 = vmatpush3.bf16.msra.mxu1 %v3108_v4  ;;  %v3177_v4 = vld [vmem:[#allocation11 + $0x108] ss:$12 sps:$4 sm:$0xff]   ;;  %v3181_v6 = vld [vmem:[#allocation11 + $0x50] ss:$12 sps:$4 sm:$0xff]  }
  0x9b   :  { %770 = vmatprep.subr.bf16.mxu0 %v3113_v7  ;;  %1493 = vmatprep.subr.bf16.mxu1 %v3117_v8  ;;  %v3185_v7 = vld [vmem:[#allocation11 + $0x128] ss:$12 sps:$4 sm:$0xff]   ;;  %v3184_v8 = vld [vmem:[#allocation11 + $0x124] ss:$12 sps:$4 sm:$0xff]  }
  0x9d   :  { %730 = vmatmul.mubr.bf16.vlgmr.msra.gmra.mrb[0].mxu0 %v3637_v38  ;;  %2694 = vmatmul.mubr.bf16.vlgmr.msra.gmra.mrb[16].mxu1 %v3661_v10 }
  0x9e   :  { %771 = vmatpush1.bf16.msra.mxu0 %v3111_v9  ;;  %1494 = vmatpush1.bf16.msra.mxu1 %v3115_v11  ;;  %v3182_v9 = vld [vmem:[#allocation11 + $0x120] ss:$12 sps:$4 sm:$0xff]   ;;  %v3186_v11 = vld [vmem:[#allocation11 + $0x68] ss:$12 sps:$4 sm:$0xff]  }
  0x9f   :  { %772 = vmatprep.subr.bf16.mxu0 %v3120_v12  ;;  %1495 = vmatprep.subr.bf16.mxu1 %v3123_v13  ;;  %v3190_v12 = vld [vmem:[#allocation11 + $0x140] ss:$12 sps:$4 sm:$0xff]   ;;  %v3189_v13 = vld [vmem:[#allocation11 + $0x13c] ss:$12 sps:$4 sm:$0xff]  }
  0xa0   :  { %739 = vmatprep.mubr.bf16.mxu0 %v3639_v42  ;;  %2697 = vmatprep.mubr.bf16.mxu1 %v3664_v15 }
  0xa2   :  { %773 = vmatpush1.bf16.msra.mxu0 %v3118_v14  ;;  %1496 = vmatpush1.bf16.msra.mxu1 %v3121_v16  ;;  %v3191_v14 = vld [vmem:[#allocation11 + $0x80] ss:$12 sps:$4 sm:$0xff]   ;;  %v3187_v16 = vld [vmem:[#allocation11 + $0x138] ss:$12 sps:$4 sm:$0xff]  }
  0xa3   :  { %774 = vmatprep.subr.bf16.mxu0 %v3127_v17  ;;  %1497 = vmatprep.subr.bf16.mxu1 %v3131_v18  ;;  %v3195_v17 = vld [vmem:[#allocation11 + $0x158] ss:$12 sps:$4 sm:$0xff]   ;;  %v3194_v18 = vld [vmem:[#allocation11 + $0x154] ss:$12 sps:$4 sm:$0xff]  }
  0xa5   :  { %740 = vmatmul.mubr.bf16.gmra.mrb[4].mxu0 %v3643_v46  ;;  %2698 = vmatmul.mubr.bf16.gmra.mrb[20].mxu1 %v3669_v20 }
  0xa6   :  { %775 = vmatpush1.bf16.msra.mxu0 %v3125_v19  ;;  %1498 = vmatpush1.bf16.msra.mxu1 %v3129_v21  ;;  %v3196_v19 = vld [vmem:[#allocation11 + $0x98] ss:$12 sps:$4 sm:$0xff]   ;;  %v3192_v21 = vld [vmem:[#allocation11 + $0x150] ss:$12 sps:$4 sm:$0xff]  }
  0xa7   :  { %776 = vmatprep.subr.bf16.mxu0 %v3134_v22  ;;  %1499 = vmatprep.subr.bf16.mxu1 %v3137_v23  ;;  %v3200_v22 = vld [vmem:[#allocation11 + $0x170] ss:$12 sps:$4 sm:$0xff]   ;;  %v3199_v23 = vld [vmem:[#allocation11 + $0x16c] ss:$12 sps:$4 sm:$0xff]  }
  0xa8   :  { %749 = vmatprep.mubr.bf16.mxu0 %v3645_v50  ;;  %1525 = vmatprep.mubr.bf16.mxu1 %v3633_v33 }
  0xaa   :  { %777 = vmatpush1.bf16.msra.mxu0 %v3132_v24  ;;  %1500 = vmatpush1.bf16.msra.mxu1 %v3135_v25  ;;  %v3201_v24 = vld [vmem:[#allocation11 + $0xb0] ss:$12 sps:$4 sm:$0xff]   ;;  %v3197_v25 = vld [vmem:[#allocation11 + $0x168] ss:$12 sps:$4 sm:$0xff]  }
  0xab   :  { %778 = vmatprep.subr.bf16.mxu0 %v3140_v26  ;;  %1501 = vmatprep.subr.bf16.mxu1 %v3143_v27  ;;  %v3205_v26 = vld [vmem:[#allocation11 + $0x188] ss:$12 sps:$4 sm:$0xff]   ;;  %v3204_v27 = vld [vmem:[#allocation11 + $0x184] ss:$12 sps:$4 sm:$0xff]  }
  0xad   :  { %750 = vmatmul.mubr.bf16.gmra.mrb[8].mxu0 %v3649_v54 }
  0xae   :  { %779 = vmatpush1.bf16.msra.mxu0 %v3138_v28  ;;  %759 = vmatprep.mubr.bf16.mxu0 %v3651_v58  ;;  %v3202_v28 = vld [vmem:[#allocation11 + $0x180] ss:$12 sps:$4 sm:$0xff]  }
  0xaf   :  { %1502 = vmatpush1.bf16.msra.mxu1 %v3141_v29  ;;  %780 = vmatprep.subr.bf16.mxu0 %v3146_v30  ;;  %v3209_v29 = vld [vmem:[#allocation11 + $0x1a0] ss:$12 sps:$4 sm:$0xff]   ;;  %v3208_v30 = vld [vmem:[#allocation11 + $0x19c] ss:$12 sps:$4 sm:$0xff]  }
  0xb0   :  { %1503 = vmatprep.subr.bf16.mxu1 %v3149_v31  ;;  %v3213_v31 = vld [vmem:[#allocation11 + $0x1b8] ss:$12 sps:$4 sm:$0xff]  }
  0xb2   :  { %781 = vmatpush1.bf16.msra.mxu0 %v3144_v32  ;;  %v3212_v32 = vld [vmem:[#allocation11 + $0x1b4] ss:$12 sps:$4 sm:$0xff]  }
  0xb3   :  { %1504 = vmatpush1.bf16.msra.mxu1 %v3147_v34  ;;  %782 = vmatprep.subr.bf16.mxu0 %v3152_v35  ;;  %v3210_v34 = vld [vmem:[#allocation11 + $0x1b0] ss:$12 sps:$4 sm:$0xff]  }
  0xb4   :  { %1505 = vmatprep.subr.bf16.mxu1 %v3155_v36  ;;  %v3217_v35 = vld [vmem:[#allocation11 + $0x1d0] ss:$12 sps:$4 sm:$0xff]   ;;  %v3216_v36 = vld [vmem:[#allocation11 + $0x1cc] ss:$12 sps:$4 sm:$0xff]  }
  0xb5   :  { %760 = vmatmul.mubr.bf16.gmra.mrb[12].mxu0 %v3655_v62 }
  0xb6   :  { %783 = vmatpush1.bf16.msra.mxu0 %v3150_v37  ;;  %802 = vmatprep.mubr.bf16.mxu0 %v3446_v44  ;;  %v3221_v37 = vld [vmem:[#allocation11 + $0x1e8] ss:$12 sps:$4 sm:$0xff]  }
  0xb7   :  { %1506 = vmatpush1.bf16.msra.mxu1 %v3153_v39  ;;  %784 = vmatprep.subr.bf16.mxu0 %v3158_v40  ;;  %v3218_v39 = vld [vmem:[#allocation11 + $0x1e0] ss:$12 sps:$4 sm:$0xff]  }
  0xb8   :  { %1507 = vmatprep.subr.bf16.mxu1 %v3161_v41  ;;  %v3225_v40 = vld [vmem:[#allocation11 + $0x200] ss:$12 sps:$4 sm:$0xff]   ;;  %v3224_v41 = vld [vmem:[#allocation11 + $0x1fc] ss:$12 sps:$4 sm:$0xff]  }
  0xba   :  { %785 = vmatpush1.bf16.msra.mxu0 %v3156_v43  ;;  %v3229_v43 = vld [vmem:[#allocation11 + $0x218] ss:$12 sps:$4 sm:$0xff]  }
  0xbb   :  { %1508 = vmatpush1.bf16.msra.mxu1 %v3159_v45  ;;  %2591 = vmatprep.subr.bf16.mxu0 %v3165_v47  ;;  %v3226_v45 = vld [vmem:[#allocation11 + $0x210] ss:$12 sps:$4 sm:$0xff]  }
  0xbc   :  { %1509 = vmatprep.subr.bf16.mxu1 %v3164_v48  ;;  %v3233_v47 = vld [vmem:[#allocation11 + $0x230] ss:$12 sps:$4 sm:$0xff]   ;;  %v3232_v48 = vld [vmem:[#allocation11 + $0x22c] ss:$12 sps:$4 sm:$0xff]  }
  0xbd   :  { %803 = vmatmul.mubr.bf16.vlgmr.msra.gmra.mrb[0].mxu0 %v3657_v5 }
  0xbe   :  { %2592 = vmatpush3.bf16.msra.mxu0 %v3166_v51  ;;  %812 = vmatprep.mubr.bf16.mxu0 %v3446_v44 }
  0xbf   :  { %1510 = vmatpush1.bf16.msra.mxu1 %v3162_v49  ;;  %2593 = vmatprep.subr.bf16.mxu0 %v3170_v52 }
  0xc0   :  { %1511 = vmatprep.subr.bf16.mxu1 %v3169_v53 }
  0xc2   :  { %2594 = vmatpush3.bf16.msra.mxu0 %v3171_v56 }
  0xc3   :  { %1512 = vmatpush1.bf16.msra.mxu1 %v3167_v55  ;;  %2595 = vmatprep.subr.bf16.mxu0 %v3175_v57 }
  0xc4   :  { %1513 = vmatprep.subr.bf16.mxu1 %v3174_v59 }
  0xc5   :  { %813 = vmatmul.mubr.bf16.gmra.mrb[4].mxu0 %v3661_v10 }
  0xc6   :  { %2596 = vmatpush3.bf16.msra.mxu0 %v3176_v61  ;;  %822 = vmatprep.mubr.bf16.mxu0 %v3446_v44  ;;  %v234_v61 = vlaneseq }
  0xc7   :  { %1514 = vmatpush1.bf16.msra.mxu1 %v3172_v60  ;;  %2597 = vmatprep.subr.bf16.mxu0 %v3180_v63 }
  0xc8   :  { %1515 = vmatprep.subr.bf16.mxu1 %v3179_v3 }
  0xca   :  { %2598 = vmatpush3.bf16.msra.mxu0 %v3181_v6 }
  0xcb   :  { %1516 = vmatpush1.bf16.msra.mxu1 %v3177_v4  ;;  %2599 = vmatprep.subr.bf16.mxu0 %v3185_v7 }
  0xcc   :  { %1517 = vmatprep.subr.bf16.mxu1 %v3184_v8 }
  0xcd   :  { %823 = vmatmul.mubr.bf16.gmra.mrb[8].mxu0 %v3664_v15 }
  0xce   :  { %2600 = vmatpush3.bf16.msra.mxu0 %v3186_v11  ;;  %832 = vmatprep.mubr.bf16.mxu0 %v3446_v44 }
  0xcf   :  { %1518 = vmatpush1.bf16.msra.mxu1 %v3182_v9  ;;  %2601 = vmatprep.subr.bf16.mxu0 %v3190_v12 }
  0xd0   :  { %1519 = vmatprep.subr.bf16.mxu1 %v3189_v13 }
  0xd2   :  { %2602 = vmatpush3.bf16.msra.mxu0 %v3191_v14 }
  0xd3   :  { %1520 = vmatpush1.bf16.msra.mxu1 %v3187_v16  ;;  %2603 = vmatprep.subr.bf16.mxu0 %v3195_v17 }
  0xd4   :  { %1521 = vmatprep.subr.bf16.mxu1 %v3194_v18 }
  0xd5   :  { %833 = vmatmul.mubr.bf16.gmra.mrb[12].mxu0 %v3669_v20 }
  0xd6   :  { %2604 = vmatpush3.bf16.msra.mxu0 %v3196_v19  ;;  %1671 = vmatprep.mubr.bf16.mxu0 %v3633_v33  ;;  %v3206_v33 = vld [vmem:[#allocation11 + $0x198] ss:$12 sps:$4 sm:$0xff]  }
  0xd7   :  { %1522 = vmatpush1.bf16.msra.mxu1 %v3192_v21  ;;  %2605 = vmatprep.subr.bf16.mxu0 %v3200_v22 }
  0xd8   :  { %1523 = vmatprep.subr.bf16.mxu1 %v3199_v23 }
  0xda   :  { %2606 = vmatpush3.bf16.msra.mxu0 %v3201_v24 }
  0xdb   :  { %1524 = vmatpush1.bf16.msra.mxu1 %v3197_v25  ;;  %2701 = vmatprep.subr.bf16.mxu0 %v3205_v26 }
  0xdc   :  { %1566 = vmatprep.subr.bf16.mxu1 %v3204_v27 }
  0xdd   :  { %1672 = vmatmul.mubr.bf16.vlgmr.msra.gmra.mrb[16].mxu0 %v3637_v38 }
  0xde   :  { %1526 = vmatmul.mubr.bf16.vlgmr.msra.gmra.mrb[24].mxu1 %v3637_v38  ;;  %2702 = vmatpush3.bf16.msra.mxu0 %v3205_v26  ;;  %v3214_v38 = vld [vmem:[#allocation11 + $0x1c8] ss:$12 sps:$4 sm:$0xff]  }
  0xdf   :  { %1567 = vmatpush1.bf16.msra.mxu1 %v3202_v28  ;;  %2703 = vmatprep.subr.bf16.mxu0 %v3209_v29 }
  0xe0   :  { %1568 = vmatprep.subr.bf16.mxu1 %v3208_v30  ;;  %1535 = vmatprep.mubr.bf16.mxu1 %v3639_v42 }
  0xe1   :  { %1679 = vmatprep.mubr.bf16.mxu0 %v3639_v42  ;;  %v3220_v42 = vld [vmem:[#allocation11 + $0x1e4] ss:$12 sps:$4 sm:$0xff]  }
  0xe2   :  { %2704 = vmatpush3.bf16.msra.mxu0 %v3209_v29 }
  0xe3   :  { %1569 = vmatpush1.bf16.msra.mxu1 %v3206_v33  ;;  %2705 = vmatprep.subr.bf16.mxu0 %v3213_v31 }
  0xe4   :  { %1570 = vmatprep.subr.bf16.mxu1 %v3212_v32 }
  0xe5   :  { %1680 = vmatmul.mubr.bf16.gmra.mrb[20].mxu0 %v3643_v46 }
  0xe6   :  { %1536 = vmatmul.mubr.bf16.gmra.mrb[28].mxu1 %v3643_v46  ;;  %2706 = vmatpush3.bf16.msra.mxu0 %v3213_v31  ;;  %v3222_v46 = vld [vmem:[#allocation11 + $0x1f8] ss:$12 sps:$4 sm:$0xff]  }
  0xe7   :  { %1571 = vmatpush1.bf16.msra.mxu1 %v3210_v34  ;;  %2707 = vmatprep.subr.bf16.mxu0 %v3217_v35 }
  0xe8   :  { %1572 = vmatprep.subr.bf16.mxu1 %v3216_v36  ;;  %1545 = vmatprep.mubr.bf16.mxu1 %v3645_v50 }
  0xe9   :  { %1687 = vmatprep.mubr.bf16.mxu0 %v3645_v50  ;;  %v3228_v50 = vld [vmem:[#allocation11 + $0x214] ss:$12 sps:$4 sm:$0xff]  }
  0xea   :  { %2708 = vmatpush3.bf16.msra.mxu0 %v3217_v35 }
  0xeb   :  { %1573 = vmatpush1.bf16.msra.mxu1 %v3214_v38  ;;  %2709 = vmatprep.subr.bf16.mxu0 %v3221_v37 }
  0xec   :  { %1574 = vmatprep.subr.bf16.mxu1 %v3220_v42 }
  0xed   :  { %1688 = vmatmul.mubr.bf16.gmra.mrb[24].mxu0 %v3649_v54 }
  0xee   :  { %1546 = vmatmul.mubr.bf16.gmra.mrb[32].mxu1 %v3649_v54  ;;  %2710 = vmatpush3.bf16.msra.mxu0 %v3221_v37  ;;  %v3230_v54 = vld [vmem:[#allocation11 + $0x228] ss:$12 sps:$4 sm:$0xff]  }
  0xef   :  { %1575 = vmatpush1.bf16.msra.mxu1 %v3218_v39  ;;  %2711 = vmatprep.subr.bf16.mxu0 %v3225_v40 }
  0xf0   :  { %1576 = vmatprep.subr.bf16.mxu1 %v3224_v41  ;;  %1555 = vmatprep.mubr.bf16.mxu1 %v3651_v58 }
  0xf1   :  { %1695 = vmatprep.mubr.bf16.mxu0 %v3651_v58 }
  0xf2   :  { %2712 = vmatpush3.bf16.msra.mxu0 %v3225_v40 }
  0xf3   :  { %1577 = vmatpush1.bf16.msra.mxu1 %v3222_v46  ;;  %2713 = vmatprep.subr.bf16.mxu0 %v3229_v43 }
  0xf4   :  { %1578 = vmatprep.subr.bf16.mxu1 %v3228_v50 }
  0xf5   :  { %1696 = vmatmul.mubr.bf16.gmra.mrb[28].mxu0 %v3655_v62 }
  0xf6   :  { %1556 = vmatmul.mubr.bf16.gmra.mrb[36].mxu1 %v3655_v62  ;;  %2714 = vmatpush3.bf16.msra.mxu0 %v3229_v43 }
  0xf7   :  { %1579 = vmatpush1.bf16.msra.mxu1 %v3226_v45  ;;  %2715 = vmatprep.subr.bf16.mxu0 %v3233_v47 }
  0xf8   :  { %1580 = vmatprep.subr.bf16.mxu1 %v3232_v48  ;;  %1598 = vmatprep.mubr.bf16.mxu1 %v3446_v44 }
  0xf9   :  { %2717 = vmatprep.mubr.bf16.mxu0 %v3657_v5 }
  0xfa   :  { %2716 = vmatpush3.bf16.msra.mxu0 %v3233_v47 }
  0xfb   :  { %1581 = vmatpush1.bf16.msra.mxu1 %v3230_v54 }
  0xfd   :  { %2718 = vmatmul.mubr.bf16.vlgmr.msra.gmra.mrb[32].mxu0 %v3661_v10 }
  0xfe   :  { %1599 = vmatmul.mubr.bf16.vlgmr.msra.gmra.mrb[24].mxu1 %v3657_v5  ;;  %2721 = vmatprep.mubr.bf16.mxu0 %v3664_v15 }
  0xff   :  { %1608 = vmatprep.mubr.bf16.mxu1 %v3446_v44 }
 0x105   :  { %2722 = vmatmul.mubr.bf16.gmra.mrb[36].mxu0 %v3669_v20 }
 0x106   :  { %1609 = vmatmul.mubr.bf16.gmra.mrb[28].mxu1 %v3661_v10 }
 0x107   :  { %1618 = vmatprep.mubr.bf16.mxu1 %v3446_v44 }
 0x10e   :  { %1619 = vmatmul.mubr.bf16.gmra.mrb[32].mxu1 %v3664_v15 }
 0x10f   :  { %1628 = vmatprep.mubr.bf16.mxu1 %v3446_v44 }
 0x116   :  { %1629 = vmatmul.mubr.bf16.gmra.mrb[36].mxu1 %v3669_v20  ;;  %v3713_v20 = vshrl.u32 %v234_v61, 7 }
 0x118   :  { %v244_v7 = vsub.s32 2, %v3713_v20  ;;  %v236_v40 = vsub.s32 0, %v3713_v20  ;;  %v240_v41 = vsub.s32 1, %v3713_v20 }
 0x11a   :  { %v245_v14 = vrot.slane %v3619_v1, %v244_v7  ;;  %v237_v46 = vrot.slane %v3619_v1, %v236_v40  ;;  %v241_v43 = vrot.slane %v3619_v1, %v240_v41 }
 0x150   :  { %v2555_v58 = vpop.f32.mrb[0].mxu1 }
 0x151   :  { %v2556_v62 = vpop.f32.mrb[1].mxu1 }
 0x152   :  { %v2557_v49 = vadd.f32 %v2556_v62, %v2555_v58  ;;  %v2558_v5 = vpop.f32.mrb[2].mxu1 }
 0x153   :  { %v2559_v51 = vpop.f32.mrb[3].mxu1 }
 0x154   :  { %v2560_v52 = vadd.f32 %v2559_v51, %v2558_v5  ;;  %v878_v18 = vadd.f32 %v2557_v49, %v245_v14 }
 0x156   :  { %v881_v25 = vadd.f32 %v2560_v52, %v245_v14 }
 0x158   :  { %v2561_v53 = vpop.f32.mrb[4].mxu1 }
 0x159   :  { %v2562_v55 = vpop.f32.mrb[5].mxu1 }
 0x15a   :  { %v2563_v56 = vadd.f32 %v2562_v55, %v2561_v53  ;;  %v2564_v57 = vpop.f32.mrb[6].mxu1 }
 0x15b   :  { %v2565_v59 = vpop.f32.mrb[7].mxu1 }
 0x15c   :  { %v2566_v10 = vadd.f32 %v2565_v59, %v2564_v57  ;;  %v886_v16 = vadd.f32 %v2563_v56, %v245_v14 }
 0x15e   :  { %v889_v22 = vadd.f32 %v2566_v10, %v245_v14 }
 0x160   :  { %v2567_v60 = vpop.f32.mrb[8].mxu1 }
 0x161   :  { %v2568_v63 = vpop.f32.mrb[9].mxu1 }
 0x162   :  { %v2569_v15 = vadd.f32 %v2568_v63, %v2567_v60  ;;  %v2570_v3 = vpop.f32.mrb[10].mxu1 }
 0x163   :  { %v2571_v44 = vpop.f32.mrb[11].mxu1 }
 0x164   :  { %v2572_v4 = vadd.f32 %v2571_v44, %v2570_v3  ;;  %v894_v33 = vadd.f32 %v2569_v15, %v245_v14 }
 0x166   :  { %v897_v38 = vadd.f32 %v2572_v4, %v245_v14 }
 0x168   :  { %v2573_v6 = vpop.f32.mrb[12].mxu1 }
 0x169   :  { %v2574_v8 = vpop.f32.mrb[13].mxu1 }
 0x16a   :  { %v2575_v9 = vadd.f32 %v2574_v8, %v2573_v6  ;;  %v2576_v11 = vpop.f32.mrb[14].mxu1 }
 0x16b   :  { %v2577_v12 = vpop.f32.mrb[15].mxu1 }
 0x16c   :  { %v2578_v13 = vadd.f32 %v2577_v12, %v2576_v11  ;;  %v902_v29 = vadd.f32 %v2575_v9, %v245_v14 }
 0x16e   :  { %v905_v34 = vadd.f32 %v2578_v13, %v245_v14 }
 0x170   :  { %v2695_v17 = vpop.f32.mrb[16].mxu1 }
 0x171   :  { %v951_v19 = vadd.f32 %v2695_v17, %v886_v16  ;;  %v942_v21 = vpop.f32.mrb[17].mxu1 }
 0x172   :  { %v943_v23 = vadd.f32 %v942_v21, %v878_v18  ;;  %v2696_v24 = vpop.f32.mrb[18].mxu1 }
 0x173   :  { %981 = vst [vmem:[#allocation2 + $0x40] sm:$0xff] %v951_v19  ;;  %v954_v26 = vadd.f32 %v2696_v24, %v889_v22  ;;  %v945_v27 = vpop.f32.mrb[19].mxu1 }
 0x174   :  { %975 = vst [vmem:[#allocation2 + $0x10] sm:$0xff] %v943_v23  ;;  %v946_v28 = vadd.f32 %v945_v27, %v881_v25 }
 0x175   :  { %984 = vst [vmem:[#allocation2 + $0x58] sm:$0xff] %v954_v26 }
 0x176   :  { %978 = vst [vmem:[#allocation2 + $0x28] sm:$0xff] %v946_v28 }
 0x178   :  { %v2699_v30 = vpop.f32.mrb[20].mxu1 }
 0x179   :  { %v967_v31 = vadd.f32 %v2699_v30, %v902_v29  ;;  %v958_v32 = vpop.f32.mrb[21].mxu1 }
 0x17a   :  { %v959_v35 = vadd.f32 %v958_v32, %v894_v33  ;;  %v2700_v36 = vpop.f32.mrb[22].mxu1 }
 0x17b   :  { %993 = vst [vmem:[#allocation2 + $0xa0] sm:$0xff] %v967_v31  ;;  %v970_v37 = vadd.f32 %v2700_v36, %v905_v34  ;;  %v961_v42 = vpop.f32.mrb[23].mxu1 }
 0x17c   :  { %987 = vst [vmem:[#allocation2 + $0x70] sm:$0xff] %v959_v35  ;;  %v962_v39 = vadd.f32 %v961_v42, %v897_v38 }
 0x17d   :  { %996 = vst [vmem:[#allocation2 + $0xb8] sm:$0xff] %v970_v37 }
 0x17e   :  { %990 = vst [vmem:[#allocation2 + $0x88] sm:$0xff] %v962_v39 }
 0x190   :  { %v804_v50 = vpop.f32.mrb[0].mxu0 }
 0x191   :  { %v2907_v45 = vadd.f32 %v804_v50, %v237_v46  ;;  %v806_v47 = vpop.f32.mrb[1].mxu0 }
 0x192   :  { %v2908_v48 = vadd.f32 %v806_v47, %v241_v43  ;;  %v808_v54 = vpop.f32.mrb[2].mxu0 }
 0x193   :  { %973 = vst [vmem:[#allocation2] sm:$0xff] %v2907_v45  ;;  %v2909_v58 = vadd.f32 %v808_v54, %v237_v46  ;;  %v810_v62 = vpop.f32.mrb[3].mxu0  ;;  %v3738_v45 = vrot.slane %v3624_v2, %v240_v41 }
 0x194   :  { %974 = vst [vmem:[#allocation2 + $0x8] sm:$0xff] %v2908_v48  ;;  %v2910_v49 = vadd.f32 %v810_v62, %v241_v43 }
 0x195   :  { %976 = vst [vmem:[#allocation2 + $0x18] sm:$0xff] %v2909_v58 }
 0x196   :  { %977 = vst [vmem:[#allocation2 + $0x20] sm:$0xff] %v2910_v49 }
 0x198   :  { %v814_v5 = vpop.f32.mrb[4].mxu0 }
 0x199   :  { %v2911_v51 = vadd.f32 %v814_v5, %v237_v46  ;;  %v816_v52 = vpop.f32.mrb[5].mxu0 }
 0x19a   :  { %v2912_v53 = vadd.f32 %v816_v52, %v241_v43  ;;  %v818_v55 = vpop.f32.mrb[6].mxu0 }
 0x19b   :  { %979 = vst [vmem:[#allocation2 + $0x30] sm:$0xff] %v2911_v51  ;;  %v2913_v56 = vadd.f32 %v818_v55, %v237_v46  ;;  %v820_v1 = vpop.f32.mrb[7].mxu0 }
 0x19c   :  { %980 = vst [vmem:[#allocation2 + $0x38] sm:$0xff] %v2912_v53  ;;  %v2914_v57 = vadd.f32 %v820_v1, %v241_v43 }
 0x19d   :  { %982 = vst [vmem:[#allocation2 + $0x48] sm:$0xff] %v2913_v56 }
 0x19e   :  { %983 = vst [vmem:[#allocation2 + $0x50] sm:$0xff] %v2914_v57 }
 0x1a0   :  { %v824_v59 = vpop.f32.mrb[8].mxu0 }
 0x1a1   :  { %v2915_v10 = vadd.f32 %v824_v59, %v237_v46  ;;  %v826_v60 = vpop.f32.mrb[9].mxu0 }
 0x1a2   :  { %v2916_v61 = vadd.f32 %v826_v60, %v241_v43  ;;  %v828_v63 = vpop.f32.mrb[10].mxu0 }
 0x1a3   :  { %985 = vst [vmem:[#allocation2 + $0x60] sm:$0xff] %v2915_v10  ;;  %v2917_v15 = vadd.f32 %v828_v63, %v237_v46  ;;  %v830_v3 = vpop.f32.mrb[11].mxu0 }
 0x1a4   :  { %986 = vst [vmem:[#allocation2 + $0x68] sm:$0xff] %v2916_v61  ;;  %v2918_v44 = vadd.f32 %v830_v3, %v241_v43 }
 0x1a5   :  { %988 = vst [vmem:[#allocation2 + $0x78] sm:$0xff] %v2917_v15 }
 0x1a6   :  { %989 = vst [vmem:[#allocation2 + $0x80] sm:$0xff] %v2918_v44 }
 0x1a8   :  { %v834_v4 = vpop.f32.mrb[12].mxu0 }
 0x1a9   :  { %v2919_v6 = vadd.f32 %v834_v4, %v237_v46  ;;  %v836_v8 = vpop.f32.mrb[13].mxu0 }
 0x1aa   :  { %v2920_v9 = vadd.f32 %v836_v8, %v241_v43  ;;  %v838_v11 = vpop.f32.mrb[14].mxu0 }
 0x1ab   :  { %991 = vst [vmem:[#allocation2 + $0x90] sm:$0xff] %v2919_v6  ;;  %v2921_v12 = vadd.f32 %v838_v11, %v237_v46  ;;  %v840_v13 = vpop.f32.mrb[15].mxu0  ;;  %v1105_v46 = vrot.slane %v3624_v2, %v244_v7 }
 0x1ac   :  { %992 = vst [vmem:[#allocation2 + $0x98] sm:$0xff] %v2920_v9  ;;  %v2922_v14 = vadd.f32 %v840_v13, %v241_v43  ;;  %v3733_v43 = vrot.slane %v3624_v2, %v236_v40 }
 0x1ad   :  { %994 = vst [vmem:[#allocation2 + $0xa8] sm:$0xff] %v2921_v12 }
 0x1ae   :  { %995 = vst [vmem:[#allocation2 + $0xb0] sm:$0xff] %v2922_v14 }
 0x1b0   :  { %v2607_v16 = vpop.f32.mrb[16].mxu0 }
 0x1b1   :  { %v2608_v17 = vpop.f32.mrb[17].mxu0 }
 0x1b2   :  { %v2609_v18 = vadd.f32 %v2608_v17, %v2607_v16  ;;  %v2610_v19 = vpop.f32.mrb[18].mxu0 }
 0x1b3   :  { %v2611_v21 = vpop.f32.mrb[19].mxu0 }
 0x1b4   :  { %v2612_v22 = vadd.f32 %v2611_v21, %v2610_v19  ;;  %v1674_v48 = vadd.f32 %v2609_v18, %v1105_v46 }
 0x1b6   :  { %v1677_v53 = vadd.f32 %v2612_v22, %v1105_v46 }
 0x1b8   :  { %v2613_v23 = vpop.f32.mrb[20].mxu0 }
 0x1b9   :  { %v2614_v24 = vpop.f32.mrb[21].mxu0 }
 0x1ba   :  { %v2615_v25 = vadd.f32 %v2614_v24, %v2613_v23  ;;  %v2616_v26 = vpop.f32.mrb[22].mxu0 }
 0x1bb   :  { %v2617_v27 = vpop.f32.mrb[23].mxu0 }
 0x1bc   :  { %v2618_v28 = vadd.f32 %v2617_v27, %v2616_v26  ;;  %v1682_v50 = vadd.f32 %v2615_v25, %v1105_v46 }
 0x1be   :  { %v1685_v49 = vadd.f32 %v2618_v28, %v1105_v46 }
 0x1c0   :  { %v2619_v29 = vpop.f32.mrb[24].mxu0 }
 0x1c1   :  { %v2620_v30 = vpop.f32.mrb[25].mxu0 }
 0x1c2   :  { %v2621_v33 = vadd.f32 %v2620_v30, %v2619_v29  ;;  %v2622_v31 = vpop.f32.mrb[26].mxu0 }
 0x1c3   :  { %v2623_v32 = vpop.f32.mrb[27].mxu0 }
 0x1c4   :  { %v2624_v34 = vadd.f32 %v2623_v32, %v2622_v31  ;;  %v1690_v61 = vadd.f32 %v2621_v33, %v1105_v46 }
 0x1c6   :  { %v1693_v9 = vadd.f32 %v2624_v34, %v1105_v46 }
 0x1c8   :  { %v2625_v35 = vpop.f32.mrb[28].mxu0 }
 0x1c9   :  { %v2626_v36 = vpop.f32.mrb[29].mxu0 }
 0x1ca   :  { %v2627_v38 = vadd.f32 %v2626_v36, %v2625_v35  ;;  %v2628_v37 = vpop.f32.mrb[30].mxu0 }
 0x1cb   :  { %v2629_v42 = vpop.f32.mrb[31].mxu0 }
 0x1cc   :  { %v2630_v39 = vadd.f32 %v2629_v42, %v2628_v37  ;;  %v1698_v59 = vadd.f32 %v2627_v38, %v1105_v46 }
 0x1ce   :  { %v1701_v10 = vadd.f32 %v2630_v39, %v1105_v46 }
 0x1d0   :  { %v2719_v47 = vpop.f32.mrb[32].mxu0 }
 0x1d1   :  { %v1600_v54 = vpop.f32.mrb[24].mxu1  ;;  %v1747_v58 = vadd.f32 %v2719_v47, %v1682_v50  ;;  %v1738_v62 = vpop.f32.mrb[33].mxu0 }
 0x1d2   :  { %v2923_v5 = vadd.f32 %v1600_v54, %v3733_v43  ;;  %v1602_v7 = vpop.f32.mrb[25].mxu1  ;;  %v1739_v51 = vadd.f32 %v1738_v62, %v1674_v48  ;;  %v2720_v52 = vpop.f32.mrb[34].mxu0 }
 0x1d3   :  { %1777 = vst [vmem:[#allocation3 + $0x40] sm:$0xff] %v1747_v58  ;;  %v2924_v40 = vadd.f32 %v1602_v7, %v3738_v45  ;;  %v1604_v55 = vpop.f32.mrb[26].mxu1  ;;  %v1750_v20 = vadd.f32 %v2720_v52, %v1685_v49  ;;  %v1741_v56 = vpop.f32.mrb[35].mxu0 }
 0x1d4   :  { %1769 = vst [vmem:[#allocation3] sm:$0xff] %v2923_v5  ;;  %1771 = vst [vmem:[#allocation3 + $0x10] sm:$0xff] %v1739_v51  ;;  %v2925_v2 = vadd.f32 %v1604_v55, %v3733_v43  ;;  %v1606_v41 = vpop.f32.mrb[27].mxu1  ;;  %v1742_v1 = vadd.f32 %v1741_v56, %v1677_v53 }
 0x1d5   :  { %1770 = vst [vmem:[#allocation3 + $0x8] sm:$0xff] %v2924_v40  ;;  %1780 = vst [vmem:[#allocation3 + $0x58] sm:$0xff] %v1750_v20  ;;  %v2926_v57 = vadd.f32 %v1606_v41, %v3738_v45 }
 0x1d6   :  { %1772 = vst [vmem:[#allocation3 + $0x18] sm:$0xff] %v2925_v2  ;;  %1774 = vst [vmem:[#allocation3 + $0x28] sm:$0xff] %v1742_v1 }
 0x1d7   :  { %1773 = vst [vmem:[#allocation3 + $0x20] sm:$0xff] %v2926_v57 }
 0x1d8   :  { %v2723_v60 = vpop.f32.mrb[36].mxu0 }
 0x1d9   :  { %v1610_v63 = vpop.f32.mrb[28].mxu1  ;;  %v1763_v15 = vadd.f32 %v2723_v60, %v1698_v59  ;;  %v1754_v3 = vpop.f32.mrb[37].mxu0 }
 0x1da   :  { %v2927_v44 = vadd.f32 %v1610_v63, %v3733_v43  ;;  %v1612_v4 = vpop.f32.mrb[29].mxu1  ;;  %v1755_v6 = vadd.f32 %v1754_v3, %v1690_v61  ;;  %v2724_v8 = vpop.f32.mrb[38].mxu0 }
 0x1db   :  { %1789 = vst [vmem:[#allocation3 + $0xa0] sm:$0xff] %v1763_v15  ;;  %v2928_v11 = vadd.f32 %v1612_v4, %v3738_v45  ;;  %v1614_v12 = vpop.f32.mrb[30].mxu1  ;;  %v1766_v13 = vadd.f32 %v2724_v8, %v1701_v10  ;;  %v1757_v14 = vpop.f32.mrb[39].mxu0 }
 0x1dc   :  { %1775 = vst [vmem:[#allocation3 + $0x30] sm:$0xff] %v2927_v44  ;;  %1783 = vst [vmem:[#allocation3 + $0x70] sm:$0xff] %v1755_v6  ;;  %v2929_v16 = vadd.f32 %v1614_v12, %v3733_v43  ;;  %v1616_v17 = vpop.f32.mrb[31].mxu1  ;;  %v1758_v18 = vadd.f32 %v1757_v14, %v1693_v9 }
 0x1dd   :  { %1776 = vst [vmem:[#allocation3 + $0x38] sm:$0xff] %v2928_v11  ;;  %1792 = vst [vmem:[#allocation3 + $0xb8] sm:$0xff] %v1766_v13  ;;  %v2930_v19 = vadd.f32 %v1616_v17, %v3738_v45 }
 0x1de   :  { %1778 = vst [vmem:[#allocation3 + $0x48] sm:$0xff] %v2929_v16  ;;  %1786 = vst [vmem:[#allocation3 + $0x88] sm:$0xff] %v1758_v18 }
 0x1df   :  { %1779 = vst [vmem:[#allocation3 + $0x50] sm:$0xff] %v2930_v19 }
 0x1e1   :  { %v1620_v21 = vpop.f32.mrb[32].mxu1 }
 0x1e2   :  { %v2931_v22 = vadd.f32 %v1620_v21, %v3733_v43  ;;  %v1622_v23 = vpop.f32.mrb[33].mxu1 }
 0x1e3   :  { %v2932_v24 = vadd.f32 %v1622_v23, %v3738_v45  ;;  %v1624_v25 = vpop.f32.mrb[34].mxu1 }
 0x1e4   :  { %1781 = vst [vmem:[#allocation3 + $0x60] sm:$0xff] %v2931_v22  ;;  %v2933_v26 = vadd.f32 %v1624_v25, %v3733_v43  ;;  %v1626_v27 = vpop.f32.mrb[35].mxu1 }
 0x1e5   :  { %1782 = vst [vmem:[#allocation3 + $0x68] sm:$0xff] %v2932_v24  ;;  %v2934_v28 = vadd.f32 %v1626_v27, %v3738_v45 }
 0x1e6   :  { %1784 = vst [vmem:[#allocation3 + $0x78] sm:$0xff] %v2933_v26 }
 0x1e7   :  { %1785 = vst [vmem:[#allocation3 + $0x80] sm:$0xff] %v2934_v28 }
 0x1e9   :  { %v1630_v29 = vpop.f32.mrb[36].mxu1 }
 0x1ea   :  { %v2935_v30 = vadd.f32 %v1630_v29, %v3733_v43  ;;  %v1632_v33 = vpop.f32.mrb[37].mxu1 }
 0x1eb   :  { %v2936_v31 = vadd.f32 %v1632_v33, %v3738_v45  ;;  %v1634_v32 = vpop.f32.mrb[38].mxu1 }
 0x1ec   :  { %1787 = vst [vmem:[#allocation3 + $0x90] sm:$0xff] %v2935_v30  ;;  %v2937_v34 = vadd.f32 %v1634_v32, %v3733_v43  ;;  %v1636_v35 = vpop.f32.mrb[39].mxu1 }
 0x1ed   :  { %1788 = vst [vmem:[#allocation3 + $0x98] sm:$0xff] %v2936_v31  ;;  %v2938_v36 = vadd.f32 %v1636_v35, %v3738_v45 }
 0x1ee   :  { %1790 = vst [vmem:[#allocation3 + $0xa8] sm:$0xff] %v2937_v34 }
 0x1ef   :  { %1791 = vst [vmem:[#allocation3 + $0xb0] sm:$0xff] %v2938_v36 }
 0x1f0 PF:  { %v3756_v38 = vld [vmem:[#allocation12] sm:$0xff]  ;;  %v3758_v37 = vld [vmem:[#allocation12 + $0x8] sm:$0xff]  ;;  %v3760_v42 = vld [vmem:[#allocation12 + $0x10] sm:$0xff]  ;;  %s3988_s16 = smov (!%p2370_p12), 0  }
 0x1f1   :  { %4212 = vst [vmem:[#allocation21_spill] sm:$0xff] %v3758_v37  ;;  %v3762_v39 = vld [vmem:[#allocation12 + $0x18] sm:$0xff]  ;;  %v3764_v46 = vld [vmem:[#allocation12 + $0x20] sm:$0xff]  ;;  %v3766_v50 = vld [vmem:[#allocation12 + $0x28] sm:$0xff] }
 0x1f2   :  { %4213 = vst [vmem:[#allocation22_spill] sm:$0xff] %v3764_v46  ;;  %v3768_v43 = vld [vmem:[#allocation12 + $0x30] sm:$0xff]  ;;  %v3770_v47 = vld [vmem:[#allocation12 + $0x38] sm:$0xff]  ;;  %v3772_v45 = vld [vmem:[#allocation12 + $0x40] sm:$0xff] }
 0x1f3   :  { %v3774_v48 = vld [vmem:[#allocation12 + $0x48] sm:$0xff]  ;;  %v3776_v54 = vld [vmem:[#allocation12 + $0x50] sm:$0xff]  ;;  %v3778_v58 = vld [vmem:[#allocation12 + $0x58] sm:$0xff] }
 0x1f4   :  { %v3780_v62 = vld [vmem:[#allocation12 + $0x60] sm:$0xff]  ;;  %v3782_v49 = vld [vmem:[#allocation12 + $0x68] sm:$0xff]  ;;  %v3784_v5 = vld [vmem:[#allocation12 + $0x70] sm:$0xff] }
 0x1f5   :  { %4214 = vst [vmem:[#allocation23_spill] sm:$0xff] %v3784_v5  ;;  %v3786_v7 = vld [vmem:[#allocation12 + $0x78] sm:$0xff]  ;;  %v3788_v51 = vld [vmem:[#allocation12 + $0x80] sm:$0xff]  ;;  %v3790_v52 = vld [vmem:[#allocation12 + $0x88] sm:$0xff] }
 0x1f6   :  { %4215 = vst [vmem:[#allocation24_spill] sm:$0xff] %v3786_v7  ;;  %v3792_v53 = vld [vmem:[#allocation12 + $0x90] sm:$0xff]  ;;  %v3794_v40 = vld [vmem:[#allocation12 + $0x98] sm:$0xff]  ;;  %v3796_v55 = vld [vmem:[#allocation12 + $0xa0] sm:$0xff] }
 0x1f7   :  { %v3798_v20 = vld [vmem:[#allocation12 + $0xa8] sm:$0xff]  ;;  %v3800_v56 = vld [vmem:[#allocation12 + $0xb0] sm:$0xff]  ;;  %v3802_v2 = vld [vmem:[#allocation12 + $0xb8] sm:$0xff] }
 0x1f8   :  { %4216 = vst [vmem:[#allocation25_spill] sm:$0xff] %v3802_v2  ;;  %v3804_v41 = vld [vmem:[#allocation12 + $0xc0] sm:$0xff]  ;;  %v3806_v1 = vld [vmem:[#allocation12 + $0xc8] sm:$0xff]  ;;  %v3808_v57 = vld [vmem:[#allocation12 + $0xd0] sm:$0xff] }
 0x1f9   :  { %4217 = vst [vmem:[#allocation26_spill] sm:$0xff] %v3806_v1  ;;  %v3810_v59 = vld [vmem:[#allocation12 + $0xd8] sm:$0xff]  ;;  %v3812_v10 = vld [vmem:[#allocation12 + $0xe0] sm:$0xff]  ;;  %v3814_v60 = vld [vmem:[#allocation12 + $0xe8] sm:$0xff] }
 0x1fa   :  { %4218 = vst [vmem:[#allocation27_spill] sm:$0xff] %v3812_v10  ;;  %v3816_v61 = vld [vmem:[#allocation12 + $0xf0] sm:$0xff]  ;;  %v3818_v63 = vld [vmem:[#allocation12 + $0xf8] sm:$0xff]  ;;  %v3820_v15 = vld [vmem:[#allocation12 + $0x100] sm:$0xff] }
 0x1fb   :  { %v3822_v3 = vld [vmem:[#allocation12 + $0x108] sm:$0xff]  ;;  %v3824_v44 = vld [vmem:[#allocation12 + $0x110] sm:$0xff]  ;;  %v3826_v4 = vld [vmem:[#allocation12 + $0x118] sm:$0xff] }
 0x1fc   :  { %4219 = vst [vmem:[#allocation28_spill] sm:$0xff] %v3822_v3  ;;  %4220 = vst [vmem:[#allocation29_spill] sm:$0xff] %v3826_v4  ;;  %v3828_v6 = vld [vmem:[#allocation12 + $0x120] sm:$0xff]  ;;  %v3830_v8 = vld [vmem:[#allocation12 + $0x128] sm:$0xff] }
 0x1fd   :  { %4221 = vst [vmem:[#allocation30_spill] sm:$0xff] %v3828_v6  ;;  %4222 = vst [vmem:[#allocation31_spill] sm:$0xff] %v3830_v8  ;;  %v3832_v9 = vld [vmem:[#allocation12 + $0x130] sm:$0xff]  ;;  %v3834_v11 = vld [vmem:[#allocation12 + $0x138] sm:$0xff] }
 0x1fe   :  { %4223 = vst [vmem:[#allocation32_spill] sm:$0xff] %v3832_v9  ;;  %4224 = vst [vmem:[#allocation33_spill] sm:$0xff] %v3834_v11  ;;  %v3836_v12 = vld [vmem:[#allocation12 + $0x140] sm:$0xff]  ;;  %v3838_v13 = vld [vmem:[#allocation12 + $0x148] sm:$0xff] }
 0x1ff   :  { %v3840_v14 = vld [vmem:[#allocation12 + $0x150] sm:$0xff]  ;;  %v3842_v16 = vld [vmem:[#allocation12 + $0x158] sm:$0xff]  ;;  %v3844_v17 = vld [vmem:[#allocation12 + $0x160] sm:$0xff] }
 0x200   :  { %v3846_v18 = vld [vmem:[#allocation12 + $0x168] sm:$0xff]  ;;  %v3848_v19 = vld [vmem:[#allocation12 + $0x170] sm:$0xff]  ;;  %v3850_v21 = vld [vmem:[#allocation12 + $0x178] sm:$0xff] }
 0x201   :  { %v3852_v22 = vld [vmem:[#allocation14] sm:$0xff]  ;;  %v3854_v23 = vld [vmem:[#allocation14 + $0x8] sm:$0xff]  ;;  %v3856_v24 = vld [vmem:[#allocation14 + $0x10] sm:$0xff] }
 0x202   :  { %4225 = vst [vmem:[#allocation34_spill] sm:$0xff] %v3852_v22  ;;  %4226 = vst [vmem:[#allocation35_spill] sm:$0xff] %v3856_v24  ;;  %v3858_v25 = vld [vmem:[#allocation14 + $0x18] sm:$0xff]  ;;  %v3860_v26 = vld [vmem:[#allocation14 + $0x20] sm:$0xff]  ;;  %v3978_v22 = vmov 0.0  }
 0x203   :  { %4227 = vst [vmem:[#allocation36_spill] sm:$0xff] %v3858_v25  ;;  %v3862_v27 = vld [vmem:[#allocation14 + $0x28] sm:$0xff]  ;;  %v3864_v28 = vld [vmem:[#allocation14 + $0x30] sm:$0xff]  ;;  %v3866_v29 = vld [vmem:[#allocation14 + $0x38] sm:$0xff] }
 0x204   :  { %4228 = vst [vmem:[#allocation37_spill] sm:$0xff] %v3862_v27  ;;  %4229 = vst [vmem:[#allocation38_spill] sm:$0xff] %v3864_v28  ;;  %v3868_v30 = vld [vmem:[#allocation14 + $0x40] sm:$0xff]  ;;  %v3870_v33 = vld [vmem:[#allocation14 + $0x48] sm:$0xff] }
 0x205   :  { %4230 = vst [vmem:[#allocation39_spill] sm:$0xff] %v3866_v29  ;;  %4231 = vst [vmem:[#allocation40_spill] sm:$0xff] %v3868_v30  ;;  %v3872_v31 = vld [vmem:[#allocation14 + $0x50] sm:$0xff]  ;;  %v3874_v32 = vld [vmem:[#allocation14 + $0x58] sm:$0xff]  ;;  %v1891_v29 = vlaneseq }
 0x206   :  { %4232 = vst [vmem:[#allocation41_spill] sm:$0xff] %v3870_v33  ;;  %4233 = vst [vmem:[#allocation42_spill] sm:$0xff] %v3872_v31  ;;  %v3876_v34 = vld [vmem:[#allocation14 + $0x60] sm:$0xff]  ;;  %v3878_v35 = vld [vmem:[#allocation14 + $0x68] sm:$0xff] }
 0x207   :  { %4234 = vst [vmem:[#allocation43_spill] sm:$0xff] %v3874_v32  ;;  %4235 = vst [vmem:[#allocation44_spill] sm:$0xff] %v3876_v34  ;;  %v3880_v36 = vld [vmem:[#allocation14 + $0x70] sm:$0xff]  ;;  %v3882_v24 = vld [vmem:[#allocation14 + $0x78] sm:$0xff] }
 0x208   :  { %4236 = vst [vmem:[#allocation45_spill] sm:$0xff] %v3878_v35  ;;  %4237 = vst [vmem:[#allocation46_spill] sm:$0xff] %v3880_v36  ;;  %v3884_v27 = vld [vmem:[#allocation14 + $0x80] sm:$0xff]  ;;  %v3886_v28 = vld [vmem:[#allocation14 + $0x88] sm:$0xff] }
 0x209   :  { %4238 = vst [vmem:[#allocation47_spill] sm:$0xff] %v3882_v24  ;;  %4239 = vst [vmem:[#allocation48_spill] sm:$0xff] %v3884_v27  ;;  %v3888_v30 = vld [vmem:[#allocation14 + $0x90] sm:$0xff]  ;;  %v3890_v33 = vld [vmem:[#allocation14 + $0x98] sm:$0xff] }
 0x20a   :  { %4240 = vst [vmem:[#allocation49_spill] sm:$0xff] %v3886_v28  ;;  %4241 = vst [vmem:[#allocation50_spill] sm:$0xff] %v3888_v30  ;;  %v3892_v31 = vld [vmem:[#allocation14 + $0xa0] sm:$0xff]  ;;  %v3894_v32 = vld [vmem:[#allocation14 + $0xa8] sm:$0xff] }
 0x20b   :  { %4242 = vst [vmem:[#allocation51_spill] sm:$0xff] %v3890_v33  ;;  %4243 = vst [vmem:[#allocation52_spill] sm:$0xff] %v3892_v31  ;;  %v3896_v34 = vld [vmem:[#allocation14 + $0xb0] sm:$0xff]  ;;  %v3898_v35 = vld [vmem:[#allocation14 + $0xb8] sm:$0xff]  ;;  %v1892_v33 = vshrl.u32 %v1891_v29, 7 }
 0x20c   :  { %4244 = vst [vmem:[#allocation53_spill] sm:$0xff] %v3894_v32  ;;  %4245 = vst [vmem:[#allocation54_spill] sm:$0xff] %v3896_v34  ;;  %v3900_v36 = vld [vmem:[#allocation14 + $0xc0] sm:$0xff]  ;;  %v3902_v24 = vld [vmem:[#allocation14 + $0xc8] sm:$0xff] }
 0x20d   :  { %4246 = vst [vmem:[#allocation55_spill] sm:$0xff] %v3898_v35  ;;  %4247 = vst [vmem:[#allocation56_spill] sm:$0xff] %v3900_v36  ;;  %v3904_v27 = vld [vmem:[#allocation14 + $0xd0] sm:$0xff]  ;;  %v3906_v28 = vld [vmem:[#allocation14 + $0xd8] sm:$0xff] }
 0x20e   :  { %4248 = vst [vmem:[#allocation57_spill] sm:$0xff] %v3902_v24  ;;  %4249 = vst [vmem:[#allocation58_spill] sm:$0xff] %v3904_v27  ;;  %v3908_v25 = vld [vmem:[#allocation14 + $0xe0] sm:$0xff]  ;;  %v3910_v30 = vld [vmem:[#allocation14 + $0xe8] sm:$0xff] }
 0x20f   :  { %4250 = vst [vmem:[#allocation59_spill] sm:$0xff] %v3906_v28  ;;  %4251 = vst [vmem:[#allocation60_spill] sm:$0xff] %v3908_v25  ;;  %v3912_v31 = vld [vmem:[#allocation14 + $0xf0] sm:$0xff]  ;;  %v3914_v32 = vld [vmem:[#allocation14 + $0xf8] sm:$0xff] }
 0x210   :  { %4252 = vst [vmem:[#allocation61_spill] sm:$0xff] %v3910_v30  ;;  %4253 = vst [vmem:[#allocation62_spill] sm:$0xff] %v3912_v31  ;;  %v3916_v34 = vld [vmem:[#allocation14 + $0x100] sm:$0xff]  ;;  %v3918_v35 = vld [vmem:[#allocation14 + $0x108] sm:$0xff] }
 0x211   :  { %4254 = vst [vmem:[#allocation63_spill] sm:$0xff] %v3914_v32  ;;  %4255 = vst [vmem:[#allocation64_spill] sm:$0xff] %v3916_v34  ;;  %v3920_v36 = vld [vmem:[#allocation14 + $0x110] sm:$0xff]  ;;  %v3922_v24 = vld [vmem:[#allocation14 + $0x118] sm:$0xff]  ;;  %v3936_v32 = vsub.s32 0, %v1892_v33  ;;  %v3938_v34 = vsub.s32 1, %v1892_v33 }
 0x212   :  { %4256 = vst [vmem:[#allocation65_spill] sm:$0xff] %v3918_v35  ;;  %4257 = vst [vmem:[#allocation66_spill] sm:$0xff] %v3920_v36  ;;  %v3924_v27 = vld [vmem:[#allocation14 + $0x120] sm:$0xff]  ;;  %v3926_v28 = vld [vmem:[#allocation14 + $0x128] sm:$0xff]  ;;  %v1901_v35 = vsub.s32 2, %v1892_v33 }
 0x213   :  { %4258 = vst [vmem:[#allocation67_spill] sm:$0xff] %v3922_v24  ;;  %4259 = vst [vmem:[#allocation68_spill] sm:$0xff] %v3924_v27  ;;  %v3928_v25 = vld [vmem:[#allocation14 + $0x130] sm:$0xff]  ;;  %v3930_v30 = vld [vmem:[#allocation14 + $0x138] sm:$0xff] }
 0x214   :  { %4260 = vst [vmem:[#allocation69_spill] sm:$0xff] %v3926_v28  ;;  %4261 = vst [vmem:[#allocation70_spill] sm:$0xff] %v3928_v25  ;;  %v3932_v29 = vld [vmem:[#allocation14 + $0x140] sm:$0xff]  ;;  %v3934_v31 = vld [vmem:[#allocation14 + $0x148] sm:$0xff] }
 0x215   :  { %4262 = vst [vmem:[#allocation71_spill] sm:$0xff] %v3930_v30  ;;  %4263 = vst [vmem:[#allocation72_spill] sm:$0xff] %v3932_v29  ;;  %v3940_v36 = vld [vmem:[#allocation14 + $0x150] sm:$0xff]  ;;  %v3942_v24 = vld [vmem:[#allocation14 + $0x158] sm:$0xff]  ;;  %v3976_v29 = vmov 0.0  }
 0x216   :  { %4264 = vst [vmem:[#allocation73_spill] sm:$0xff] %v3934_v31  ;;  %4265 = vst [vmem:[#allocation74_spill] sm:$0xff] %v3940_v36  ;;  %v3944_v27 = vld [vmem:[#allocation14 + $0x160] sm:$0xff]  ;;  %v3946_v28 = vld [vmem:[#allocation14 + $0x168] sm:$0xff]  ;;  %2363 = sbr.rel (%p2370_p12) target bundleno = 871 (0x367), region = 95  ;;  %v3986_v36 = vmov (!%p2370_p12), 0.0  }
 0x217   :  { %4266 = vst [vmem:[#allocation75_spill] sm:$0xff] %v3942_v24  ;;  %4267 = vst [vmem:[#allocation76_spill] sm:$0xff] %v3944_v27  ;;  %v3948_v25 = vld [vmem:[#allocation14 + $0x170] sm:$0xff]  ;;  %v3950_v30 = vld [vmem:[#allocation14 + $0x178] sm:$0xff]  ;;  %v3984_v27 = vmov (!%p2370_p12), 0.0  }
 0x218   :  { %4268 = vst [vmem:[#allocation77_spill] sm:$0xff] %v3946_v28  ;;  %4269 = vst [vmem:[#allocation78_spill] sm:$0xff] %v3948_v25  ;;  %v3955_v31 = vld [vmem:[%s4202_s8] sm:$0x7] }
 0x219   :  { %4270 = vst [vmem:[#allocation79_spill] sm:$0xff] %v3950_v30  ;;  %v3960_v33 = vld [vmem:[%s4204_s10] sm:$0x7]  ;;  %v3967_v28 = vrot.slane %v3955_v31, %v1901_v35 }
 0x21a   :  { %v3974_v24 = vrot.slane %v3960_v33, %v1901_v35 }
 0x21c   :  { %4271 = vst [vmem:[#allocation80_spill] sm:$0xff] %v3974_v24 }
 0x21d LB: > { %v4272_v0 = vld [vmem:[#allocation20_spill] sm:$0xff]  ;;  %v4273_v37 = vld [vmem:[#allocation21_spill] sm:$0xff]  ;;  %v4274_v46 = vld [vmem:[#allocation22_spill] sm:$0xff]  ;;  %v2797_v22 = vpack.c.bf16 %v3762_v39, %v3756_v38  ;;  %v2799_v29 = vpack.c.bf16 %v3776_v54, %v3770_v47  ;;  %v2801_v25 = vpack.c.bf16 %v3774_v48, %v3768_v43  ;;  %v2803_v30 = vpack.c.bf16 %v3788_v51, %v3782_v49  ;;  %s2528_s17 = sadd.s32 4294967295, %s4194_s0  ;;  %s2529_s19 = sshll.u32 %s3427_s16, 3  ;;  %v3419_v27 = vphi %v3984_v27, %v4338_v27   ;;  %s3427_s16 = sphi %s3988_s16, %s1926_s16   ;;  %v3423_v36 = vphi %v3986_v36, %v4339_v36  }
 0x21e   : > { %v2795_v35 = vpack.c.bf16 %v4274_v46, %v4273_v37  ;;  %v3447_v24 = vmov 0.0|0.0   ;;  %v2828_v37 = vpack.c.bf16 %v3766_v50, %v3760_v42  ;;  %v4208_v46 = vmov 0.0   ;;  %v4275_v7 = vld [vmem:[#allocation24_spill] sm:$0xff]  ;;  %v4276_v5 = vld [vmem:[#allocation23_spill] sm:$0xff]  ;;  %s4031_s18 = ssub.s32 %s2528_s17, %s3427_s16  ;;  %v4277_v1 = vld [vmem:[#allocation26_spill] sm:$0xff]  ;;  %s1935_s23 = sshra.s32 %s2529_s19, 3 }
 0x21f   : > { %2827 = vmatprep.subr.bf16.mxu1 %v3447_v24  ;;  %2015 = vmatprep.mubr.f32.mxu0 %v4208_v46  ;;  %vm3449_vm0 = vmmov 0   ;;  %v4278_v10 = vld [vmem:[#allocation27_spill] sm:$0xff]  ;;  %v4279_v2 = vld [vmem:[#allocation25_spill] sm:$0xff]  ;;  %v4280_v3 = vld [vmem:[#allocation28_spill] sm:$0xff]  ;;  %s2537_s25 = smul.u32 24, %s1935_s23  ;;  %s2530_s5 = sshll.u32 %s4031_s18, 3 }
 0x220   : > { %2796 = vmatprep.subr.bf16.mxu0 %v2795_v35  ;;  %2829 = vmatpush3.bf16.msra.mxu1 %v2828_v37  ;;  %v2831_v35 = vpack.c.bf16 %v3778_v58, %v3772_v45  ;;  %v2834_v37 = vpack.c.bf16 %v3790_v52, %v4276_v5  ;;  %v2275_v5 = vstv %s3427_s16  ;;  %v4281_v8 = vld [vmem:[#allocation31_spill] sm:$0xff]  ;;  %v4282_v4 = vld [vmem:[#allocation29_spill] sm:$0xff]  ;;  %v4283_v6 = vld [vmem:[#allocation30_spill] sm:$0xff]  ;;  %s1943_s20 = sshra.s32 %s2530_s5, 3  ;;  %s1926_s16 = sadd.s32 1, %s3427_s16  }
 0x221   : > { %2798 = vmatpush1.bf16.msra.mxu0 %v2797_v22  ;;  %v2805_v22 = vpack.c.bf16 %v4275_v7, %v3780_v62  ;;  %2830 = vmatprep.subr.bf16.mxu1 %v3447_v24  ;;  %v2813_v7 = vpack.c.bf16 %v3810_v59, %v3804_v41  ;;  %vm2276_vm1 = vcmp.lt.s32.totalorder %v2275_v5, %v4272_v0  ;;  %v4284_v11 = vld [vmem:[#allocation33_spill] sm:$0xff]  ;;  %v4285_v9 = vld [vmem:[#allocation32_spill] sm:$0xff]  ;;  %s1939_s27 = scalar_lea.vmem [#allocation2], %s2537_s25  ;;  %s2538_s21 = smul.u32 24, %s1943_s20 }
 0x222   : > { %2800 = vmatprep.subr.bf16.mxu0 %v2799_v29  ;;  %v2807_v29 = vpack.c.bf16 %v3800_v56, %v3794_v40  ;;  %2757 = vmatprep.mubr.msk.f32.mxu1 %vm3449_vm0, %v4208_v46  ;;  %v3450_v46 = vmov 0   ;;  %v2819_v5 = vpack.c.bf16 %v3836_v12, %v4281_v8  ;;  %v4305_v8 = vld [vmem:[#allocation50_spill] sm:$0xff]  ;;  %p1925_p13 = scmp.ge.s32.totalorder %s1926_s16, %s4194_s0 }
 0x223   : > { %3234 = vset.pattern.permute.xlu0 %v3450_v46  ;;  %s4140_s24 = scalar_lea.vmem [#allocation3], %s2538_s21 }
 0x224   : > { %2832 = vmatpush3.bf16.msra.mxu1 %v2831_v35  ;;  %v2837_v35 = vpack.c.bf16 %v4279_v2, %v3796_v55  ;;  %v2817_v2 = vpack.c.bf16 %v4280_v3, %v3816_v61 }
 0x225   : > { %2802 = vmatpush1.bf16.msra.mxu0 %v2801_v25  ;;  %v2809_v25 = vpack.c.bf16 %v3798_v20, %v3792_v53  ;;  %2833 = vmatprep.subr.bf16.mxu1 %v3447_v24 }
 0x226   : > { %2804 = vmatprep.subr.bf16.mxu0 %v2803_v30  ;;  %v2811_v30 = vpack.c.bf16 %v4278_v10, %v4277_v1  ;;  %v2840_v1 = vpack.c.bf16 %v3814_v60, %v3808_v57 }
 0x228   : > { %2835 = vmatpush3.bf16.msra.mxu1 %v2834_v37  ;;  %v2277_v37 = vsel %vm2276_vm1, 1, %v3450_v46 }
 0x229   : > { %2806 = vmatpush1.bf16.msra.mxu0 %v2805_v22  ;;  %v2283_v22 = vstv %s4031_s18  ;;  %2836 = vmatprep.subr.bf16.mxu1 %v3447_v24 }
 0x22a   : > { %2808 = vmatprep.subr.bf16.mxu0 %v2807_v29  ;;  %vm2284_vm2 = vcmp.lt.s32.totalorder %v2283_v22, %v4272_v0  ;;  %v2815_v29 = vpack.c.bf16 %v3824_v44, %v3818_v63  ;;  %2279 = vperm.xlu0 %3234, %v2277_v37   ;;  %v2849_v22 = vpack.c.bf16 %v3850_v21, %v3844_v17  ;;  %v4287_v37 = vld [vmem:[#allocation36_spill] sm:$0xff]  ;;  %v4291_v0 = vld [vmem:[#allocation37_spill] sm:$0xff] }
 0x22c   : > { %2838 = vmatpush3.bf16.msra.mxu1 %v2837_v35  ;;  %v2821_v35 = vpack.c.bf16 %v4284_v11, %v4283_v6 }
 0x22d   : > { %2810 = vmatpush1.bf16.msra.mxu0 %v2809_v25  ;;  %v2285_v25 = vsel %vm2284_vm2, 1, %v3450_v46  ;;  %2839 = vmatprep.subr.bf16.mxu1 %v3447_v24  ;;  %v2823_v46 = vpack.c.bf16 %v3848_v19, %v3842_v16 }
 0x22e   : > { %2812 = vmatprep.subr.bf16.mxu0 %v2811_v30  ;;  %2287 = vperm.xlu0 %3234, %v2285_v25   ;;  %v2843_v30 = vpack.c.bf16 %v4282_v4, %v3820_v15  ;;  %v4293_v4 = vld [vmem:[#allocation41_spill] sm:$0xff] }
 0x230   : > { %2841 = vmatpush3.bf16.msra.mxu1 %v2840_v1  ;;  %v2825_v1 = vpack.c.bf16 %v3846_v18, %v3840_v14 }
 0x231   : > { %2814 = vmatpush1.bf16.msra.mxu0 %v2813_v7  ;;  %2842 = vmatprep.subr.bf16.mxu1 %v3447_v24  ;;  %v2846_v7 = vpack.c.bf16 %v3838_v13, %v4285_v9 }
 0x232   : > { %2816 = vmatprep.subr.bf16.mxu0 %v2815_v29  ;;  %v4286_v29 = vld [vmem:[#allocation34_spill] sm:$0xff] }
 0x233   : > { %v2853_v25 = vpack.c.bf16 %v4287_v37, %v4286_v29  ;;  %v4295_v29 = vld [vmem:[#allocation48_spill] sm:$0xff] }
 0x234   : > { %2844 = vmatpush3.bf16.msra.mxu1 %v2843_v30  ;;  %v4289_v30 = vld [vmem:[#allocation42_spill] sm:$0xff] }
 0x235   : > { %2818 = vmatpush1.bf16.msra.mxu0 %v2817_v2  ;;  %2845 = vmatprep.subr.bf16.mxu1 %v3447_v24  ;;  %v2851_v2 = vpack.c.bf16 %v3860_v26, %v3854_v23 }
 0x236   : > { %2820 = vmatprep.subr.bf16.mxu0 %v2819_v5  ;;  %v4288_v5 = vld [vmem:[#allocation39_spill] sm:$0xff] }
 0x238   : > { %2847 = vmatpush3.bf16.msra.mxu1 %v2846_v7  ;;  %v4292_v7 = vld [vmem:[#allocation38_spill] sm:$0xff] }
 0x239   : > { %2822 = vmatpush1.bf16.msra.mxu0 %v2821_v35  ;;  %2848 = vmatprep.subr.bf16.mxu1 %v3447_v24  ;;  %v2855_v35 = vpack.c.bf16 %v4289_v30, %v4288_v5  ;;  %v2857_v6 = vpack.c.bf16 %v4293_v4, %v4292_v7  ;;  %v4297_v5 = vld [vmem:[#allocation40_spill] sm:$0xff]  ;;  %v4300_v4 = vld [vmem:[#allocation47_spill] sm:$0xff] }
 0x23a   : > { %2824 = vmatprep.subr.bf16.mxu0 %v2823_v46  ;;  %v4290_v46 = vld [vmem:[#allocation35_spill] sm:$0xff] }
 0x23b   : > { %v2884_v3 = vpack.c.bf16 %v4291_v0, %v4290_v46  ;;  %v4299_v0 = vld [vmem:[#allocation44_spill] sm:$0xff]  ;;  %v4302_v46 = vld [vmem:[#allocation54_spill] sm:$0xff] }
 0x23c   : > { %2850 = vmatpush3.bf16.msra.mxu1 %v2849_v22  ;;  %v4298_v22 = vld [vmem:[#allocation43_spill] sm:$0xff] }
 0x23d   : > { %2826 = vmatpush1.bf16.msra.mxu0 %v2825_v1  ;;  %2883 = vmatprep.subr.bf16.mxu1 %v3447_v24  ;;  %v4294_v1 = vld [vmem:[#allocation45_spill] sm:$0xff]  ;;  %v2887_v30 = vpack.c.bf16 %v4298_v22, %v4297_v5 }
 0x23e   : > { %2852 = vmatprep.subr.bf16.mxu0 %v2851_v2  ;;  %v2859_v37 = vpack.c.bf16 %v4295_v29, %v4294_v1  ;;  %v4296_v2 = vmov 0.0   ;;  %v4303_v1 = vld [vmem:[#allocation46_spill] sm:$0xff]  ;;  %v4304_v29 = vld [vmem:[#allocation49_spill] sm:$0xff] }
 0x23f   : > { %2758 = vmatmul.mubr.f32.vlgmr.msra.gmra.mrb[0].mxu1 %v3423_v36  ;;  %v4306_v5 = vld [vmem:[#allocation53_spill] sm:$0xff] }
 0x240   : > { %2016 = vmatmul.mubr.f32.vlgmr.msra.gmra.mrb[0].mxu0 %v3423_v36  ;;  %2885 = vmatpush3.bf16.msra.mxu1 %v2884_v3  ;;  %v2890_v3 = vpack.c.bf16 %v4304_v29, %v4303_v1  ;;  %v2865_v22 = vpack.c.bf16 %v4306_v5, %v4305_v8  ;;  %v4314_v1 = vld [vmem:[#allocation66_spill] sm:$0xff] }
 0x241   : > { %2854 = vmatpush1.bf16.msra.mxu0 %v2853_v25  ;;  %2177 = vmatprep.mubr.f32.mxu0 %v4296_v2  ;;  %v2861_v25 = vpack.c.bf16 %v4300_v4, %v4299_v0  ;;  %v4309_v4 = vld [vmem:[#allocation52_spill] sm:$0xff]  ;;  %v4315_v29 = vld [vmem:[#allocation58_spill] sm:$0xff] }
 0x242   : > { %2856 = vmatprep.subr.bf16.mxu0 %v2855_v35  ;;  %2792 = vmatprep.mubr.msk.f32.mxu1 %vm3449_vm0, %v4296_v2  ;;  %v4301_v35 = vld [vmem:[#allocation51_spill] sm:$0xff]  ;;  %v4308_v2 = vld [vmem:[#allocation60_spill] sm:$0xff] }
 0x243   : > { %2886 = vmatprep.subr.bf16.mxu1 %v3447_v24  ;;  %v2863_v7 = vpack.c.bf16 %v4302_v46, %v4301_v35  ;;  %v4311_v35 = vld [vmem:[#allocation56_spill] sm:$0xff] }
 0x244   : > { %2888 = vmatpush3.bf16.msra.mxu1 %v2887_v30  ;;  %v4312_v30 = vld [vmem:[#allocation59_spill] sm:$0xff] }
 0x245   : > { %2858 = vmatpush1.bf16.msra.mxu0 %v2857_v6  ;;  %2889 = vmatprep.subr.bf16.mxu1 %v3447_v24  ;;  %v4307_v6 = vld [vmem:[#allocation57_spill] sm:$0xff]  ;;  %v2869_v46 = vpack.c.bf16 %v4312_v30, %v4311_v35  ;;  %v4321_v35 = vld [vmem:[#allocation64_spill] sm:$0xff] }
 0x246   : > { %2860 = vmatprep.subr.bf16.mxu0 %v2859_v37  ;;  %v2867_v0 = vpack.c.bf16 %v4308_v2, %v4307_v6  ;;  %v4310_v37 = vld [vmem:[#allocation55_spill] sm:$0xff]  ;;  %v4317_v6 = vld [vmem:[#allocation62_spill] sm:$0xff] }
 0x247   : > { %v2893_v9 = vpack.c.bf16 %v4310_v37, %v4309_v4  ;;  %v4320_v4 = vld [vmem:[#allocation72_spill] sm:$0xff] }
 0x248   : > { %2891 = vmatpush3.bf16.msra.mxu1 %v2890_v3  ;;  %v4318_v3 = vld [vmem:[#allocation65_spill] sm:$0xff] }
 0x249   : > { %2862 = vmatpush1.bf16.msra.mxu0 %v2861_v25  ;;  %2892 = vmatprep.subr.bf16.mxu1 %v3447_v24  ;;  %v4313_v25 = vld [vmem:[#allocation63_spill] sm:$0xff]  ;;  %v2873_v2 = vpack.c.bf16 %v4318_v3, %v4317_v6  ;;  %v4328_v6 = vld [vmem:[#allocation73_spill] sm:$0xff] }
 0x24a   : > { %2864 = vmatprep.subr.bf16.mxu0 %v2863_v7  ;;  %v2871_v8 = vpack.c.bf16 %v4314_v1, %v4313_v25  ;;  %v4316_v7 = vld [vmem:[#allocation61_spill] sm:$0xff]  ;;  %v4323_v25 = vld [vmem:[#allocation68_spill] sm:$0xff] }
 0x24b   : > { %v2896_v5 = vpack.c.bf16 %v4316_v7, %v4315_v29  ;;  %v4326_v29 = vld [vmem:[#allocation78_spill] sm:$0xff] }
 0x24c   : > { %2894 = vmatpush3.bf16.msra.mxu1 %v2893_v9  ;;  %v4324_v9 = vld [vmem:[#allocation71_spill] sm:$0xff] }
 0x24d   : > { %2866 = vmatpush1.bf16.msra.mxu0 %v2865_v22  ;;  %2895 = vmatprep.subr.bf16.mxu1 %v3447_v24  ;;  %v4319_v22 = vld [vmem:[#allocation69_spill] sm:$0xff]  ;;  %v2877_v1 = vpack.c.bf16 %v4324_v9, %v4323_v25  ;;  %v4333_v25 = vrot.slane %v3955_v31, %v3936_v32 }
 0x24e   : > { %2868 = vmatprep.subr.bf16.mxu0 %v2867_v0  ;;  %v2875_v37 = vpack.c.bf16 %v4320_v4, %v4319_v22  ;;  %v4322_v0 = vld [vmem:[#allocation67_spill] sm:$0xff]  ;;  %v4330_v22 = vld [vmem:[#allocation77_spill] sm:$0xff] }
 0x24f   : > { %v2899_v30 = vpack.c.bf16 %v4322_v0, %v4321_v35  ;;  %v4332_v35 = vld [vmem:[#allocation79_spill] sm:$0xff] }
 0x250   : > { %2897 = vmatpush3.bf16.msra.mxu1 %v2896_v5  ;;  %v4329_v5 = vld [vmem:[#allocation74_spill] sm:$0xff] }
 0x251   : > { %2870 = vmatpush1.bf16.msra.mxu0 %v2869_v46  ;;  %2898 = vmatprep.subr.bf16.mxu1 %v3447_v24  ;;  %v4325_v46 = vld [vmem:[#allocation75_spill] sm:$0xff]  ;;  %v2881_v4 = vpack.c.bf16 %v4330_v22, %v4329_v5 }
 0x252   : > { %2872 = vmatprep.subr.bf16.mxu0 %v2871_v8  ;;  %v2879_v7 = vpack.c.bf16 %v4326_v29, %v4325_v46  ;;  %v4327_v8 = vld [vmem:[#allocation70_spill] sm:$0xff] }
 0x253   : > { %v2902_v3 = vpack.c.bf16 %v4328_v6, %v4327_v8 }
 0x254   : > { %2900 = vmatpush3.bf16.msra.mxu1 %v2899_v30 }
 0x255   : > { %2874 = vmatpush1.bf16.msra.mxu0 %v2873_v2  ;;  %2901 = vmatprep.subr.bf16.mxu1 %v3447_v24  ;;  %v4331_v2 = vld [vmem:[#allocation76_spill] sm:$0xff] }
 0x256   : > { %2876 = vmatprep.subr.bf16.mxu0 %v2875_v37  ;;  %v2905_v0 = vpack.c.bf16 %v4332_v35, %v4331_v2  ;;  %v1940_v37 = vld [vmem:[%s1939_s27] sm:$0xff] }
 0x258   : > { %2903 = vmatpush3.bf16.msra.mxu1 %v2902_v3 }
 0x259   : > { %2878 = vmatpush1.bf16.msra.mxu0 %v2877_v1  ;;  %2904 = vmatprep.subr.bf16.mxu1 %v3447_v24  ;;  %v1941_v1 = vld [vmem:[%s1939_s27 + $0x8] sm:$0xff]  ;;  %v4334_v24 = vrot.slane %v3955_v31, %v3938_v34 }
 0x25a   : > { %2880 = vmatprep.subr.bf16.mxu0 %v2879_v7 }
 0x25c   : > { %2906 = vmatpush3.bf16.msra.mxu1 %v2905_v0 }
 0x25d   : > { %2882 = vmatpush1.bf16.msra.mxu0 %v2881_v4 }
 0x25f   : > { %2793 = vmatmul.mubr.f32.vlgmr.msra.gmra.mrb[2].mxu1 %v3419_v27 }
 0x260   : > { %2178 = vmatmul.mubr.f32.vlgmr.msra.gmra.mrb[2].mxu0 %v3419_v27 }
 0x312   : > { %v2088_v8 = vpop.f32.mrb[0].mxu1 }
 0x313   : > { %v2017_v30 = vpop.f32.mrb[0].mxu0  ;;  %v2759_v3 = vpop.f32.mrb[1].mxu1 }
 0x314   : > { %v2018_v9 = vadd.f32 %v2017_v30, %v4333_v25  ;;  %v2019_v46 = vpop.f32.mrb[1].mxu0  ;;  %v2089_v30 = vadd.f32 %v2088_v8, %v3967_v28  ;;  %v4336_v8 = vrot.slane %v3960_v33, %v3938_v34 }
 0x315   : > { %v2020_v29 = vadd.f32 %v2019_v46, %v4334_v24  ;;  %v1942_v46 = vld [vmem:[%s1939_s27 + $0x10] sm:$0xff] }
 0x316   : > { %v2092_v7 = vadd.f32 %v2018_v9, %v1940_v37  ;;  %v1948_v9 = vld [vmem:[%s4140_s24] sm:$0xff] }
 0x317   : > { %v2099_v6 = vadd.f32 %v2020_v29, %v1941_v1  ;;  %v4335_v29 = vrot.slane %v3960_v33, %v3936_v32 }
 0x318   : > { %v2533_v5 = vmul.f32 -1.442695, %v2092_v7 }
 0x319   : > { %v2534_v22 = vmul.f32 -1.442695, %v2099_v6  ;;  %v1949_v6 = vld [vmem:[%s4140_s24 + $0x8] sm:$0xff] }
 0x31a   : > { %3235 = vpow2.f32 %v2533_v5 }
 0x31b   : > { %3237 = vpow2.f32 %v2534_v22 }
 0x324   : > { %v3236_v4 = vpop.eup %3235 }
 0x325   : > { %v2096_v2 = vadd.f32 1.0, %v3236_v4  ;;  %v3238_v35 = vpop.eup %3237 }
 0x326   : > { %v2103_v0 = vadd.f32 1.0, %v3238_v35 }
 0x327   : > { %3239 = vrcp.f32 %v2096_v2 }
 0x328   : > { %3241 = vrcp.f32 %v2103_v0 }
 0x331   : > { %v3240_v25 = vpop.eup %3239 }
 0x332   : > { %v2106_v37 = vmul.f32 %v3240_v25, %v2089_v30  ;;  %v2250_v4 = vpop.f32.mrb[2].mxu1  ;;  %v3242_v30 = vpop.eup %3241 }
 0x333   : > { %v2179_v1 = vpop.f32.mrb[2].mxu0  ;;  %v2794_v35 = vpop.f32.mrb[3].mxu1 }
 0x334   : > { %v2107_v24 = vadd.f32 %v2106_v37, %v1942_v46  ;;  %v2180_v7 = vadd.f32 %v2179_v1, %v4335_v29  ;;  %v2181_v3 = vpop.f32.mrb[3].mxu0  ;;  %v2280_v46 = vpop.permute.xlu0 %2279  ;;  %v2109_v37 = vsub.f32 1.0, %v3242_v30  ;;  %v2111_v29 = vmul.f32 %v3423_v36, %v3242_v30 }
 0x335   : > { %v2182_v5 = vadd.f32 %v2181_v3, %v4336_v8  ;;  %vm2281_vm3 = vcmp.eq.s32.totalorder %v2280_v46, 1  ;;  %v4337_v8 = vld [vmem:[#allocation80_spill] sm:$0xff] }
 0x336   : > { %3243 = vtanh.f32 %v2107_v24  ;;  %v2254_v22 = vadd.f32 %v2180_v7, %v1948_v9 }
 0x337   : > { %v2261_v2 = vadd.f32 %v2182_v5, %v1949_v6  ;;  %v2251_v5 = vadd.f32 %v2250_v4, %v4337_v8 }
 0x338   : > { %v2535_v0 = vmul.f32 -1.442695, %v2254_v22  ;;  %v2288_v46 = vpop.permute.xlu0 %2287 }
 0x339   : > { %v2536_v25 = vmul.f32 -1.442695, %v2261_v2  ;;  %v1950_v2 = vld [vmem:[%s4140_s24 + $0x10] sm:$0xff]  ;;  %vm2289_vm4 = vcmp.eq.s32.totalorder %v2288_v46, 1 }
 0x33a   : > { %3245 = vpow2.f32 %v2535_v0 }
 0x33b   : > { %3247 = vpow2.f32 %v2536_v25 }
 0x340   : > { %v3244_v10 = vpop.eup %3243 }
 0x341   : > { %v2110_v1 = vmul.f32 %v3244_v10, %v2109_v37 }
 0x343   : > { %v2112_v11 = vadd.f32 %v2111_v29, %v2110_v1 }
 0x344   : > { %v3246_v3 = vpop.eup %3245 }
 0x345   : > { %v2258_v24 = vadd.f32 1.0, %v3246_v3  ;;  %v2282_v9 = vsel %vm2281_vm3, %v2112_v11, %v3423_v36   ;;  %v3248_v7 = vpop.eup %3247 }
 0x346   : > { %v2265_v6 = vadd.f32 1.0, %v3248_v7  ;;  %v4339_v36 = vmov %v2282_v9 }
 0x347   : > { %3249 = vrcp.f32 %v2258_v24 }
 0x348   : > { %3251 = vrcp.f32 %v2265_v6 }
 0x351   : > { %v3250_v22 = vpop.eup %3249 }
 0x352   : > { %v2268_v35 = vmul.f32 %v3250_v22, %v2251_v5  ;;  %v3252_v10 = vpop.eup %3251  ;;  %v4341_v22 = vmov (%p1925_p13), %v2282_v9 }
 0x353   : > { %v2271_v25 = vsub.f32 1.0, %v3252_v10  ;;  %v2273_v1 = vmul.f32 %v3419_v27, %v3252_v10 }
 0x354   : > { %v2269_v0 = vadd.f32 %v2268_v35, %v1950_v2 }
 0x356   : > { %3253 = vtanh.f32 %v2269_v0 }
 0x360   : > { %v3254_v30 = vpop.eup %3253  ;;  %1928 = sbr.rel (!%p1925_p13) target bundleno = 541 (0x21d), region = 101 }
 0x361   : > { %v2272_v37 = vmul.f32 %v3254_v30, %v2271_v25 }
 0x363   : > { %v2274_v29 = vadd.f32 %v2273_v1, %v2272_v37 }
 0x365   : > { %v2290_v11 = vsel %vm2289_vm4, %v2274_v29, %v3419_v27  }
 0x366   : > { %v4338_v27 = vmov %v2290_v11  ;;  %v4340_v29 = vmov (%p1925_p13), %v2290_v11 }
 0x367 PF:  { %v2291_v36 = vadd.f32 %v3431_v29, %v3435_v22  ;;  %v2308_v50 = vld [vmem:[%s4205_s11] sm:$0x3]  ;;  %s3451_s3 = smov [#allocation15]   ;;  %v3435_v22 = vphi %v3978_v22, %v4341_v22   ;;  %v3431_v29 = vphi %v3976_v29, %v4340_v29  }
 0x368   :  { %v2322_v43 = vld [vmem:[%s4206_s12] sm:$0x3]  ;;  %v2313_v47 = vrot.slane %v2308_v50, %v3936_v32  ;;  %v2317_v45 = vrot.slane %v2308_v50, %v3938_v34  ;;  %s2344_s26 = sshll.u32 %s3451_s3, 4  ;;  %s2345_s26 = int_to_ptr.vmem [resolvable:$true] %s2344_s26 }
 0x369   :  { %2292 = vadd.xlane.f32.xlu0 %v2291_v36  ;;  %v2327_v62 = vrot.slane %v2322_v43, %v3936_v32  ;;  %v2331_v49 = vrot.slane %v2322_v43, %v3938_v34  ;;  %s3367_s11 = scalar_lea.vmem %s2345_s26, 256  ;;  %p3372_p1 = scmp.lt.s32.totalorder %s2345_s26, %s2345_s26 }
 0x36a   :  { %p3368_p0 = scmp.ne.s32.totalorder %s2345_s26, %s3367_s11  ;;  %p3373_p2 = scmp.lt.s32.totalorder %s3367_s11, %s3367_s11 }
 0x36c   :  { %p3374_p3 = por %p3373_p2, %p3372_p1 }
 0x36e   :  { %p3375_p4 = pnand %p3374_p3, %p3368_p0 }
 0x3f6   :  { %v2293_v4 = vpop.xlane.xlu0 %2292 }
 0x3f7   :  { %v2295_v3 = vmul.f32 0.00390625, %v2293_v4 }
 0x3f9   :  { %v2296_v24 = vsub.f32 %v3435_v22, %v2295_v3  ;;  %v2297_v7 = vsub.f32 %v3431_v29, %v2295_v3 }
 0x3fb   :  { %v2298_v6 = vmul.f32 %v2296_v24, %v2296_v24  ;;  %v2299_v8 = vmul.f32 %v2297_v7, %v2297_v7 }
 0x3fd   :  { %v2300_v5 = vadd.f32 %v2299_v8, %v2298_v6 }
 0x3ff   :  { %2301 = vadd.xlane.f32.xlu0 %v2300_v5 }
 0x48c   :  { %v2302_v38 = vpop.xlane.xlu0 %2301 }
 0x48d   :  { %v2303_v42 = vmul.f32 0.00390625, %v2302_v38 }
 0x48f   :  { %v2304_v39 = vadd.f32 1e-05, %v2303_v42 }
 0x491   :  { %3255 = vrsqrt.f32 %v2304_v39 }
 0x49b   :  { %v3256_v48 = vpop.eup %3255 }
 0x49c   :  { %v2306_v54 = vmul.f32 %v3256_v48, %v2296_v24  ;;  %v2307_v58 = vmul.f32 %v3256_v48, %v2297_v7 }
 0x49e   :  { %v2320_v51 = vmul.f32 %v2313_v47, %v2306_v54  ;;  %v2321_v52 = vmul.f32 %v2317_v45, %v2307_v58 }
 0x4a0   :  { %v2334_v53 = vadd.f32 %v2327_v62, %v2320_v51  ;;  %v2335_v40 = vadd.f32 %v2331_v49, %v2321_v52 }
 0x4a2   :  { %2336 = vst [vmem:[#allocation15] sm:$0xff] %v2334_v53  ;;  %2337 = vst [vmem:[#allocation15 + $0x8] sm:$0xff] %v2335_v40 }
 0x4a3   :  { %3378 = shalt.err (!%p3375_p4)
}
 0x4a4   :  { %s3379_s1 = scalar_lea.hbm %s4207_s13, 256 }
 0x4a5   :  { %p3380_p5 = scmp.ne.s32.totalorder %s4207_s13, %s3379_s1  ;;  %p3383_p6 = scmp.lt.u32.totalorder %s3379_s1, %s4207_s13 }
 0x4a7   :  { %p3385_p7 = pnand %p3383_p6, %p3380_p5 }
 0x4a9   :  { %3388 = shalt.err (!%p3385_p7)
}
 0x4aa   :  { %2347 = dma.vmem_to_hbm [thread:$0]  %s2345_s26, 256, %s4207_s13, [#allocation8]  }
 0x4ab   :  { %3415 = dma.done.wait [#allocation8], 256  }
 0x4ac   :  { %3416 = vsyncadd [#allocation8], 4294967040 }
 0x4ad   :  { %2351 = vsyncpa [#allocation7], 1 }
 0x4ae   :  { %2352 = vsyncpa [#allocation10], 1 }
 0x4af   :  { %2353 = vsyncpa [#allocation13], 1 }
 0x4b0   :  { %2354 = vsyncpa [#allocation8], 1 }

</bundles_post_ra>
